<compile_context>
chip_gen: v5e
topology: v5e:2x2
jax: 0.10.0
libtpu: 0.0.40
codegen_flags: <defaults>
</compile_context>

<pallas_src>
import math

import jax
import jax.numpy as jnp
import numpy as np
from jax.experimental import pallas as pl
from jax.experimental.pallas import tpu as pltpu

# ---- model hyper-parameters (from the PyTorch module) -------------------------------
HIDDEN_SIZE = 256
NUM_HEADS = 4
HEAD_DIM = HIDDEN_SIZE // NUM_HEADS          # 64
LN_EPS = 1e-6                                # module sets eps=1e-06 explicitly


def _layer_norm(x, g, b):
    mean = jnp.mean(x, axis=-1, keepdims=True)
    var = jnp.mean((x - mean) ** 2, axis=-1, keepdims=True)
    return (x - mean) * jax.lax.rsqrt(var + LN_EPS) * g + b


def _fuse_params(p):
    """Fold chained affine layers offline and pre-arrange everything for the kernel."""
    scale = 1.0 / math.sqrt(HEAD_DIM)
    H, Dh = NUM_HEADS, HEAD_DIM

    # fc_q ∘ in_proj_q (attention scale folded in), split per head -> (H, Dq, 64)
    wq_f = (p["wq"].T @ p["mq_w"].T) * scale               # (Dq, 256)
    bq_f = (p["bq"] @ p["mq_w"].T + p["mq_b"]) * scale     # (1, 256)
    Dq = wq_f.shape[0]
    wqh = jnp.transpose(wq_f.reshape(Dq, H, Dh), (1, 0, 2))   # (H, Dq, 64)
    bqh = jnp.transpose(bq_f.reshape(1, H, Dh), (1, 0, 2))    # (H, 1, 64)

    # fc_k ∘ in_proj_k, pre-arranged for transposed K:  kT_b = wkT @ ki_b^T + bkT
    wkT = p["mk_w"] @ p["wk"]                              # (256, Dk)
    bkT = (p["bk"] @ p["mk_w"].T + p["mk_b"]).T            # (256, 1)

    # fc_v ∘ in_proj_v, split per head -> (H, Dk, 64)
    wv_f = p["wv"].T @ p["mv_w"].T                         # (Dk, 256)
    bv_f = p["bv"] @ p["mv_w"].T + p["mv_b"]               # (1, 256)
    Dk = wv_f.shape[0]
    wvh = jnp.transpose(wv_f.reshape(Dk, H, Dh), (1, 0, 2))   # (H, Dk, 64)
    bvh = jnp.transpose(bv_f.reshape(1, H, Dh), (1, 0, 2))    # (H, 1, 64)

    # out_proj ∘ fc, split per head along the 256 contraction axis -> (H, 64, Dq)
    wof = p["op_w"].T @ p["fc_w"].T                        # (256, Dq)
    bof = p["op_b"] @ p["fc_w"].T + p["fc_b"]              # (1, Dq)
    wofh = wof.reshape(H, Dh, Dq)                          # (H, 64, Dq)

    # fc_1 (transposed to (in, out))
    w1 = p["fc1_w"].T                                      # (Dq, Dq)
    b1 = p["fc1_b"]                                        # (1, Dq)

    return [wqh, bqh, wkT, bkT, wvh, bvh, wofh, bof, w1, b1,
            p["ln0_g"], p["ln0_b"], p["ln1_g"], p["ln1_b"]]


def cross_attention_forward(query_i, key_i, value_i, params):
    B, Lq, Dq = query_i.shape
    _, Lk, Dk = key_i.shape
    H, Dh = NUM_HEADS, HEAD_DIM

    weight_args = [w.astype(jnp.float32) for w in _fuse_params(params)]

    # Batch stacked on the sublane axis; key pre-transposed so the kernel never
    # needs an NT contraction or an in-kernel activation transpose.
    q_all = query_i.reshape(B * Lq, Dq).astype(jnp.float32)        # (B*Lq, Dq)
    kT_in = jnp.transpose(key_i, (0, 2, 1)).astype(jnp.float32)    # (B, Dk, Lk)
    v_all = value_i.reshape(B * Lk, Dk).astype(jnp.float32)        # (B*Lk, Dk)

    def kernel(q_ref, kT_ref, v_ref,
               wqh_ref, bqh_ref, wkT_ref, bkT_ref, wvh_ref, bvh_ref,
               wofh_ref, bof_ref, w1_ref, b1_ref,
               ln0g_ref, ln0b_ref, ln1g_ref, ln1b_ref,
               o_ref):
        qi = q_ref[...]                                            # (B*Lq, Dq)
        vi = v_ref[...]                                            # (B*Lk, Dk)

        # ---- per-head fused q / v projections (no lane slicing downstream) ----------
        q_h = [jnp.dot(qi, wqh_ref[h], preferred_element_type=jnp.float32) + bqh_ref[h]
               for h in range(H)]                                  # each (B*Lq, 64)
        v_h = [jnp.dot(vi, wvh_ref[h], preferred_element_type=jnp.float32) + bvh_ref[h]
               for h in range(H)]                                  # each (B*Lk, 64)

        # ---- K projected directly in transposed form (256, Lk) per batch element ----
        kT = [jnp.dot(wkT_ref[...], kT_ref[b], preferred_element_type=jnp.float32)
              + bkT_ref[...]
              for b in range(B)]                                   # each (256, Lk)

        # ---- scores for all (b, h), sublane-stacked; one batched softmax ------------
        s_parts = []
        for b in range(B):
            for h in range(H):
                qbh = q_h[h][b * Lq:(b + 1) * Lq, :]               # (Lq, 64) sublane slice
                kbh = kT[b][h * Dh:(h + 1) * Dh, :]                # (64, Lk) sublane slice
                s_parts.append(jnp.dot(qbh, kbh, preferred_element_type=jnp.float32))
        s_all = jnp.concatenate(s_parts, axis=0)                   # (B*H*Lq, Lk)
        s_all = s_all - jnp.max(s_all, axis=-1, keepdims=True)
        p_all = jnp.exp(s_all)
        p_all = p_all * pl.reciprocal(jnp.sum(p_all, axis=-1, keepdims=True), approx=True)

        # ---- context + fused (out_proj ∘ fc), accumulated per head ------------------
        # skip = relu( sum_h ctx_h @ wof_h + bof + query_i ); layer_norm
        skip = qi + bof_ref[...]                                   # (B*Lq, Dq)
        for h in range(H):
            ctx_rows = []
            for b in range(B):
                r0 = (b * H + h) * Lq
                pbh = p_all[r0:r0 + Lq, :]                         # (Lq, Lk) sublane slice
                vbh = v_h[h][b * Lk:(b + 1) * Lk, :]               # (Lk, 64) sublane slice
                ctx_rows.append(jnp.dot(pbh, vbh, preferred_element_type=jnp.float32))
            ctx_h = jnp.concatenate(ctx_rows, axis=0)              # (B*Lq, 64)
            skip = skip + jnp.dot(ctx_h, wofh_ref[h], preferred_element_type=jnp.float32)

        skip = jnp.maximum(skip, 0.0)
        skip = _layer_norm(skip, ln0g_ref[...], ln0b_ref[...])

        # ---- new = relu(fc_1(skip) + skip); layer_norm_1 -----------------------------
        new = jnp.dot(skip, w1_ref[...], preferred_element_type=jnp.float32)
        new = new + b1_ref[...] + skip
        new = jnp.maximum(new, 0.0)
        o_ref[...] = _layer_norm(new, ln1g_ref[...], ln1b_ref[...]).astype(o_ref.dtype)

    vmem = pl.BlockSpec(memory_space=pltpu.MemorySpace.VMEM)
    out_flat = pl.pallas_call(
        kernel,
        out_shape=jax.ShapeDtypeStruct((B * Lq, Dq), jnp.float32),
        in_specs=[vmem] * (3 + len(weight_args)),
        out_specs=vmem,
    )(q_all, kT_in, v_all, *weight_args)
    return out_flat.reshape(B, Lq, Dq)


# ---- pure-JAX reference (original, unfused math) for verification ---------------------
def reference_forward(query_i, key_i, value_i, p):
    def lin(x, w, b):
        return x @ w.T + b
    query = lin(query_i, p["wq"], p["bq"])
    key = lin(key_i, p["wk"], p["bk"])
    value = lin(value_i, p["wv"], p["bv"])
    q = lin(query, p["mq_w"], p["mq_b"])
    k = lin(key, p["mk_w"], p["mk_b"])
    v = lin(value, p["mv_w"], p["mv_b"])
    B, Lq, _ = q.shape
    Lk = k.shape[1]
    qh = q.reshape(B, Lq, NUM_HEADS, HEAD_DIM)
    kh = k.reshape(B, Lk, NUM_HEADS, HEAD_DIM)
    vh = v.reshape(B, Lk, NUM_HEADS, HEAD_DIM)
    scores = jnp.einsum("bqhd,bkhd->bhqk", qh, kh) / np.sqrt(HEAD_DIM)
    probs = jax.nn.softmax(scores, axis=-1)
    ctx = jnp.einsum("bhqk,bkhd->bqhd", probs, vh).reshape(B, Lq, HIDDEN_SIZE)
    cross = lin(ctx, p["op_w"], p["op_b"])

    def ln(x, g, b):
        m = x.mean(-1, keepdims=True)
        var = ((x - m) ** 2).mean(-1, keepdims=True)
        return (x - m) / jnp.sqrt(var + LN_EPS) * g + b

    skip = lin(cross, p["fc_w"], p["fc_b"]) + query_i
    skip = jax.nn.relu(skip)
    skip = ln(skip, p["ln0_g"], p["ln0_b"])
    new = lin(skip, p["fc1_w"], p["fc1_b"]) + skip
    new = jax.nn.relu(new)
    return ln(new, p["ln1_g"], p["ln1_b"])


def make_params(key, hidden_dim_q, hidden_dim_k):
    names_shapes = {
        "wq": (HIDDEN_SIZE, hidden_dim_q), "bq": (1, HIDDEN_SIZE),
        "wk": (HIDDEN_SIZE, hidden_dim_k), "bk": (1, HIDDEN_SIZE),
        "wv": (HIDDEN_SIZE, hidden_dim_k), "bv": (1, HIDDEN_SIZE),
        "mq_w": (HIDDEN_SIZE, HIDDEN_SIZE), "mq_b": (1, HIDDEN_SIZE),
        "mk_w": (HIDDEN_SIZE, HIDDEN_SIZE), "mk_b": (1, HIDDEN_SIZE),
        "mv_w": (HIDDEN_SIZE, HIDDEN_SIZE), "mv_b": (1, HIDDEN_SIZE),
        "op_w": (HIDDEN_SIZE, HIDDEN_SIZE), "op_b": (1, HIDDEN_SIZE),
        "fc_w": (hidden_dim_q, HIDDEN_SIZE), "fc_b": (1, hidden_dim_q),
        "fc1_w": (hidden_dim_q, hidden_dim_q), "fc1_b": (1, hidden_dim_q),
    }
    params = {}
    keys = jax.random.split(key, len(names_shapes))
    for (name, shape), k in zip(names_shapes.items(), keys):
        params[name] = (0.02 * jax.random.normal(k, shape)).astype(jnp.float32)
    # LayerNorm affine params: gamma=1, beta=0 (PyTorch default init).
    params["ln0_g"] = jnp.ones((1, hidden_dim_q), jnp.float32)
    params["ln0_b"] = jnp.zeros((1, hidden_dim_q), jnp.float32)
    params["ln1_g"] = jnp.ones((1, hidden_dim_q), jnp.float32)
    params["ln1_b"] = jnp.zeros((1, hidden_dim_q), jnp.float32)
    return params


if __name__ == "__main__":
    B, Lq, Lk = 2, 8, 8
    hidden_dim_q, hidden_dim_k = 32, 48

    root = jax.random.PRNGKey(0)
    k_q, k_k, k_v, k_p = jax.random.split(root, 4)
    query_i = jax.random.normal(k_q, (B, Lq, hidden_dim_q), jnp.float32)
    key_i = jax.random.normal(k_k, (B, Lk, hidden_dim_k), jnp.float32)
    value_i = jax.random.normal(k_v, (B, Lk, hidden_dim_k), jnp.float32)
    params = make_params(k_p, hidden_dim_q, hidden_dim_k)

    out = cross_attention_forward(query_i, key_i, value_i, params)
    out = jax.block_until_ready(out)

    ref = reference_forward(query_i, key_i, value_i, params)
    # Tolerance covers the offline affine-chain fusion (fp32 reassociation) and the
    # approximate EUP reciprocal in the softmax denominator.
    np.testing.assert_allclose(np.asarray(out), np.asarray(ref), rtol=5e-3, atol=5e-3)

    print("KERNEL_OK")
</pallas_src>

<mosaic_0001>
module attributes {stable_mosaic.version = 11 : i64} {
  func.func @kernel(%arg0: memref<16x32xf32, #tpu.memory_space<vmem>>, %arg1: memref<2x48x8xf32, #tpu.memory_space<vmem>>, %arg2: memref<16x48xf32, #tpu.memory_space<vmem>>, %arg3: memref<4x32x64xf32, #tpu.memory_space<vmem>>, %arg4: memref<4x1x64xf32, #tpu.memory_space<vmem>>, %arg5: memref<256x48xf32, #tpu.memory_space<vmem>>, %arg6: memref<256x1xf32, #tpu.memory_space<vmem>>, %arg7: memref<4x48x64xf32, #tpu.memory_space<vmem>>, %arg8: memref<4x1x64xf32, #tpu.memory_space<vmem>>, %arg9: memref<4x64x32xf32, #tpu.memory_space<vmem>>, %arg10: memref<1x32xf32, #tpu.memory_space<vmem>>, %arg11: memref<32x32xf32, #tpu.memory_space<vmem>>, %arg12: memref<1x32xf32, #tpu.memory_space<vmem>>, %arg13: memref<1x32xf32, #tpu.memory_space<vmem>>, %arg14: memref<1x32xf32, #tpu.memory_space<vmem>>, %arg15: memref<1x32xf32, #tpu.memory_space<vmem>>, %arg16: memref<1x32xf32, #tpu.memory_space<vmem>>, %arg17: memref<16x32xf32, #tpu.memory_space<vmem>>) attributes {dimension_semantics = [], scalar_prefetch = 0 : i64, scratch_operands = 0 : i64, tpu.core_type = #tpu.core_type<tc>} {
    %c0 = arith.constant 0 : index
    %c0_0 = arith.constant 0 : index
    %0 = vector.load %arg0[%c0, %c0_0] : memref<16x32xf32, #tpu.memory_space<vmem>>, vector<16x32xf32>
    %c0_1 = arith.constant 0 : index
    %c0_2 = arith.constant 0 : index
    %1 = vector.load %arg2[%c0_1, %c0_2] : memref<16x48xf32, #tpu.memory_space<vmem>>, vector<16x48xf32>
    %c0_3 = arith.constant 0 : index
    %c0_4 = arith.constant 0 : index
    %c0_5 = arith.constant 0 : index
    %2 = vector.load %arg3[%c0_3, %c0_4, %c0_5] : memref<4x32x64xf32, #tpu.memory_space<vmem>>, vector<1x32x64xf32>
    %3 = vector.shape_cast %2 : vector<1x32x64xf32> to vector<32x64xf32>
    %cst = arith.constant dense<0.000000e+00> : vector<16x64xf32>
    %4 = tpu.matmul %0, %3, %cst {dimension_numbers = #tpu.dot_dimension_numbers<[1], [0], [0], [1], [0, 0, 1, 1], [], []>} : vector<16x32xf32>, vector<32x64xf32>, vector<16x64xf32> -> vector<16x64xf32>
    %c0_6 = arith.constant 0 : index
    %c0_7 = arith.constant 0 : index
    %c0_8 = arith.constant 0 : index
    %5 = vector.load %arg4[%c0_6, %c0_7, %c0_8] : memref<4x1x64xf32, #tpu.memory_space<vmem>>, vector<1x1x64xf32>
    %6 = vector.shape_cast %5 : vector<1x1x64xf32> to vector<1x64xf32>
    %7 = vector.broadcast %6 : vector<1x64xf32> to vector<16x64xf32>
    %8 = arith.addf %4, %7 : vector<16x64xf32>
    %c1 = arith.constant 1 : index
    %c0_9 = arith.constant 0 : index
    %c0_10 = arith.constant 0 : index
    %9 = vector.load %arg3[%c1, %c0_9, %c0_10] : memref<4x32x64xf32, #tpu.memory_space<vmem>>, vector<1x32x64xf32>
    %10 = vector.shape_cast %9 : vector<1x32x64xf32> to vector<32x64xf32>
    %cst_11 = arith.constant dense<0.000000e+00> : vector<16x64xf32>
    %11 = tpu.matmul %0, %10, %cst_11 {dimension_numbers = #tpu.dot_dimension_numbers<[1], [0], [0], [1], [0, 0, 1, 1], [], []>} : vector<16x32xf32>, vector<32x64xf32>, vector<16x64xf32> -> vector<16x64xf32>
    %c1_12 = arith.constant 1 : index
    %c0_13 = arith.constant 0 : index
    %c0_14 = arith.constant 0 : index
    %12 = vector.load %arg4[%c1_12, %c0_13, %c0_14] : memref<4x1x64xf32, #tpu.memory_space<vmem>>, vector<1x1x64xf32>
    %13 = vector.shape_cast %12 : vector<1x1x64xf32> to vector<1x64xf32>
    %14 = vector.broadcast %13 : vector<1x64xf32> to vector<16x64xf32>
    %15 = arith.addf %11, %14 : vector<16x64xf32>
    %c2 = arith.constant 2 : index
    %c0_15 = arith.constant 0 : index
    %c0_16 = arith.constant 0 : index
    %16 = vector.load %arg3[%c2, %c0_15, %c0_16] : memref<4x32x64xf32, #tpu.memory_space<vmem>>, vector<1x32x64xf32>
    %17 = vector.shape_cast %16 : vector<1x32x64xf32> to vector<32x64xf32>
    %cst_17 = arith.constant dense<0.000000e+00> : vector<16x64xf32>
    %18 = tpu.matmul %0, %17, %cst_17 {dimension_numbers = #tpu.dot_dimension_numbers<[1], [0], [0], [1], [0, 0, 1, 1], [], []>} : vector<16x32xf32>, vector<32x64xf32>, vector<16x64xf32> -> vector<16x64xf32>
    %c2_18 = arith.constant 2 : index
    %c0_19 = arith.constant 0 : index
    %c0_20 = arith.constant 0 : index
    %19 = vector.load %arg4[%c2_18, %c0_19, %c0_20] : memref<4x1x64xf32, #tpu.memory_space<vmem>>, vector<1x1x64xf32>
    %20 = vector.shape_cast %19 : vector<1x1x64xf32> to vector<1x64xf32>
    %21 = vector.broadcast %20 : vector<1x64xf32> to vector<16x64xf32>
    %22 = arith.addf %18, %21 : vector<16x64xf32>
    %c3 = arith.constant 3 : index
    %c0_21 = arith.constant 0 : index
    %c0_22 = arith.constant 0 : index
    %23 = vector.load %arg3[%c3, %c0_21, %c0_22] : memref<4x32x64xf32, #tpu.memory_space<vmem>>, vector<1x32x64xf32>
    %24 = vector.shape_cast %23 : vector<1x32x64xf32> to vector<32x64xf32>
    %cst_23 = arith.constant dense<0.000000e+00> : vector<16x64xf32>
    %25 = tpu.matmul %0, %24, %cst_23 {dimension_numbers = #tpu.dot_dimension_numbers<[1], [0], [0], [1], [0, 0, 1, 1], [], []>} : vector<16x32xf32>, vector<32x64xf32>, vector<16x64xf32> -> vector<16x64xf32>
    %c3_24 = arith.constant 3 : index
    %c0_25 = arith.constant 0 : index
    %c0_26 = arith.constant 0 : index
    %26 = vector.load %arg4[%c3_24, %c0_25, %c0_26] : memref<4x1x64xf32, #tpu.memory_space<vmem>>, vector<1x1x64xf32>
    %27 = vector.shape_cast %26 : vector<1x1x64xf32> to vector<1x64xf32>
    %28 = vector.broadcast %27 : vector<1x64xf32> to vector<16x64xf32>
    %29 = arith.addf %25, %28 : vector<16x64xf32>
    %c0_27 = arith.constant 0 : index
    %c0_28 = arith.constant 0 : index
    %c0_29 = arith.constant 0 : index
    %30 = vector.load %arg7[%c0_27, %c0_28, %c0_29] : memref<4x48x64xf32, #tpu.memory_space<vmem>>, vector<1x48x64xf32>
    %31 = vector.shape_cast %30 : vector<1x48x64xf32> to vector<48x64xf32>
    %cst_30 = arith.constant dense<0.000000e+00> : vector<16x64xf32>
    %32 = tpu.matmul %1, %31, %cst_30 {dimension_numbers = #tpu.dot_dimension_numbers<[1], [0], [0], [1], [0, 0, 1, 1], [], []>} : vector<16x48xf32>, vector<48x64xf32>, vector<16x64xf32> -> vector<16x64xf32>
    %c0_31 = arith.constant 0 : index
    %c0_32 = arith.constant 0 : index
    %c0_33 = arith.constant 0 : index
    %33 = vector.load %arg8[%c0_31, %c0_32, %c0_33] : memref<4x1x64xf32, #tpu.memory_space<vmem>>, vector<1x1x64xf32>
    %34 = vector.shape_cast %33 : vector<1x1x64xf32> to vector<1x64xf32>
    %35 = vector.broadcast %34 : vector<1x64xf32> to vector<16x64xf32>
    %36 = arith.addf %32, %35 : vector<16x64xf32>
    %c1_34 = arith.constant 1 : index
    %c0_35 = arith.constant 0 : index
    %c0_36 = arith.constant 0 : index
    %37 = vector.load %arg7[%c1_34, %c0_35, %c0_36] : memref<4x48x64xf32, #tpu.memory_space<vmem>>, vector<1x48x64xf32>
    %38 = vector.shape_cast %37 : vector<1x48x64xf32> to vector<48x64xf32>
    %cst_37 = arith.constant dense<0.000000e+00> : vector<16x64xf32>
    %39 = tpu.matmul %1, %38, %cst_37 {dimension_numbers = #tpu.dot_dimension_numbers<[1], [0], [0], [1], [0, 0, 1, 1], [], []>} : vector<16x48xf32>, vector<48x64xf32>, vector<16x64xf32> -> vector<16x64xf32>
    %c1_38 = arith.constant 1 : index
    %c0_39 = arith.constant 0 : index
    %c0_40 = arith.constant 0 : index
    %40 = vector.load %arg8[%c1_38, %c0_39, %c0_40] : memref<4x1x64xf32, #tpu.memory_space<vmem>>, vector<1x1x64xf32>
    %41 = vector.shape_cast %40 : vector<1x1x64xf32> to vector<1x64xf32>
    %42 = vector.broadcast %41 : vector<1x64xf32> to vector<16x64xf32>
    %43 = arith.addf %39, %42 : vector<16x64xf32>
    %c2_41 = arith.constant 2 : index
    %c0_42 = arith.constant 0 : index
    %c0_43 = arith.constant 0 : index
    %44 = vector.load %arg7[%c2_41, %c0_42, %c0_43] : memref<4x48x64xf32, #tpu.memory_space<vmem>>, vector<1x48x64xf32>
    %45 = vector.shape_cast %44 : vector<1x48x64xf32> to vector<48x64xf32>
    %cst_44 = arith.constant dense<0.000000e+00> : vector<16x64xf32>
    %46 = tpu.matmul %1, %45, %cst_44 {dimension_numbers = #tpu.dot_dimension_numbers<[1], [0], [0], [1], [0, 0, 1, 1], [], []>} : vector<16x48xf32>, vector<48x64xf32>, vector<16x64xf32> -> vector<16x64xf32>
    %c2_45 = arith.constant 2 : index
    %c0_46 = arith.constant 0 : index
    %c0_47 = arith.constant 0 : index
    %47 = vector.load %arg8[%c2_45, %c0_46, %c0_47] : memref<4x1x64xf32, #tpu.memory_space<vmem>>, vector<1x1x64xf32>
    %48 = vector.shape_cast %47 : vector<1x1x64xf32> to vector<1x64xf32>
    %49 = vector.broadcast %48 : vector<1x64xf32> to vector<16x64xf32>
    %50 = arith.addf %46, %49 : vector<16x64xf32>
    %c3_48 = arith.constant 3 : index
    %c0_49 = arith.constant 0 : index
    %c0_50 = arith.constant 0 : index
    %51 = vector.load %arg7[%c3_48, %c0_49, %c0_50] : memref<4x48x64xf32, #tpu.memory_space<vmem>>, vector<1x48x64xf32>
    %52 = vector.shape_cast %51 : vector<1x48x64xf32> to vector<48x64xf32>
    %cst_51 = arith.constant dense<0.000000e+00> : vector<16x64xf32>
    %53 = tpu.matmul %1, %52, %cst_51 {dimension_numbers = #tpu.dot_dimension_numbers<[1], [0], [0], [1], [0, 0, 1, 1], [], []>} : vector<16x48xf32>, vector<48x64xf32>, vector<16x64xf32> -> vector<16x64xf32>
    %c3_52 = arith.constant 3 : index
    %c0_53 = arith.constant 0 : index
    %c0_54 = arith.constant 0 : index
    %54 = vector.load %arg8[%c3_52, %c0_53, %c0_54] : memref<4x1x64xf32, #tpu.memory_space<vmem>>, vector<1x1x64xf32>
    %55 = vector.shape_cast %54 : vector<1x1x64xf32> to vector<1x64xf32>
    %56 = vector.broadcast %55 : vector<1x64xf32> to vector<16x64xf32>
    %57 = arith.addf %53, %56 : vector<16x64xf32>
    %c0_55 = arith.constant 0 : index
    %c0_56 = arith.constant 0 : index
    %58 = vector.load %arg5[%c0_55, %c0_56] : memref<256x48xf32, #tpu.memory_space<vmem>>, vector<256x48xf32>
    %c0_57 = arith.constant 0 : index
    %c0_58 = arith.constant 0 : index
    %c0_59 = arith.constant 0 : index
    %59 = vector.load %arg1[%c0_57, %c0_58, %c0_59] : memref<2x48x8xf32, #tpu.memory_space<vmem>>, vector<1x48x8xf32>
    %60 = vector.shape_cast %59 : vector<1x48x8xf32> to vector<48x8xf32>
    %cst_60 = arith.constant dense<0.000000e+00> : vector<256x8xf32>
    %61 = tpu.matmul %58, %60, %cst_60 {dimension_numbers = #tpu.dot_dimension_numbers<[1], [0], [0], [1], [0, 0, 1, 1], [], []>} : vector<256x48xf32>, vector<48x8xf32>, vector<256x8xf32> -> vector<256x8xf32>
    %c0_61 = arith.constant 0 : index
    %c0_62 = arith.constant 0 : index
    %62 = vector.load %arg6[%c0_61, %c0_62] : memref<256x1xf32, #tpu.memory_space<vmem>>, vector<256x1xf32>
    %63 = vector.broadcast %62 : vector<256x1xf32> to vector<256x8xf32>
    %64 = arith.addf %61, %63 : vector<256x8xf32>
    %c0_63 = arith.constant 0 : index
    %c0_64 = arith.constant 0 : index
    %65 = vector.load %arg5[%c0_63, %c0_64] : memref<256x48xf32, #tpu.memory_space<vmem>>, vector<256x48xf32>
    %c1_65 = arith.constant 1 : index
    %c0_66 = arith.constant 0 : index
    %c0_67 = arith.constant 0 : index
    %66 = vector.load %arg1[%c1_65, %c0_66, %c0_67] : memref<2x48x8xf32, #tpu.memory_space<vmem>>, vector<1x48x8xf32>
    %67 = vector.shape_cast %66 : vector<1x48x8xf32> to vector<48x8xf32>
    %cst_68 = arith.constant dense<0.000000e+00> : vector<256x8xf32>
    %68 = tpu.matmul %65, %67, %cst_68 {dimension_numbers = #tpu.dot_dimension_numbers<[1], [0], [0], [1], [0, 0, 1, 1], [], []>} : vector<256x48xf32>, vector<48x8xf32>, vector<256x8xf32> -> vector<256x8xf32>
    %c0_69 = arith.constant 0 : index
    %c0_70 = arith.constant 0 : index
    %69 = vector.load %arg6[%c0_69, %c0_70] : memref<256x1xf32, #tpu.memory_space<vmem>>, vector<256x1xf32>
    %70 = vector.broadcast %69 : vector<256x1xf32> to vector<256x8xf32>
    %71 = arith.addf %68, %70 : vector<256x8xf32>
    %72 = vector.extract_strided_slice %8 {offsets = [0, 0], sizes = [8, 64], strides = [1, 1]} : vector<16x64xf32> to vector<8x64xf32>
    %73 = vector.extract_strided_slice %64 {offsets = [0, 0], sizes = [64, 8], strides = [1, 1]} : vector<256x8xf32> to vector<64x8xf32>
    %cst_71 = arith.constant dense<0.000000e+00> : vector<8x8xf32>
    %74 = tpu.matmul %72, %73, %cst_71 {dimension_numbers = #tpu.dot_dimension_numbers<[1], [0], [0], [1], [0, 0, 1, 1], [], []>} : vector<8x64xf32>, vector<64x8xf32>, vector<8x8xf32> -> vector<8x8xf32>
    %75 = vector.extract_strided_slice %15 {offsets = [0, 0], sizes = [8, 64], strides = [1, 1]} : vector<16x64xf32> to vector<8x64xf32>
    %76 = vector.extract_strided_slice %64 {offsets = [64, 0], sizes = [64, 8], strides = [1, 1]} : vector<256x8xf32> to vector<64x8xf32>
    %cst_72 = arith.constant dense<0.000000e+00> : vector<8x8xf32>
    %77 = tpu.matmul %75, %76, %cst_72 {dimension_numbers = #tpu.dot_dimension_numbers<[1], [0], [0], [1], [0, 0, 1, 1], [], []>} : vector<8x64xf32>, vector<64x8xf32>, vector<8x8xf32> -> vector<8x8xf32>
    %78 = vector.extract_strided_slice %22 {offsets = [0, 0], sizes = [8, 64], strides = [1, 1]} : vector<16x64xf32> to vector<8x64xf32>
    %79 = vector.extract_strided_slice %64 {offsets = [128, 0], sizes = [64, 8], strides = [1, 1]} : vector<256x8xf32> to vector<64x8xf32>
    %cst_73 = arith.constant dense<0.000000e+00> : vector<8x8xf32>
    %80 = tpu.matmul %78, %79, %cst_73 {dimension_numbers = #tpu.dot_dimension_numbers<[1], [0], [0], [1], [0, 0, 1, 1], [], []>} : vector<8x64xf32>, vector<64x8xf32>, vector<8x8xf32> -> vector<8x8xf32>
    %81 = vector.extract_strided_slice %29 {offsets = [0, 0], sizes = [8, 64], strides = [1, 1]} : vector<16x64xf32> to vector<8x64xf32>
    %82 = vector.extract_strided_slice %64 {offsets = [192, 0], sizes = [64, 8], strides = [1, 1]} : vector<256x8xf32> to vector<64x8xf32>
    %cst_74 = arith.constant dense<0.000000e+00> : vector<8x8xf32>
    %83 = tpu.matmul %81, %82, %cst_74 {dimension_numbers = #tpu.dot_dimension_numbers<[1], [0], [0], [1], [0, 0, 1, 1], [], []>} : vector<8x64xf32>, vector<64x8xf32>, vector<8x8xf32> -> vector<8x8xf32>
    %84 = vector.extract_strided_slice %8 {offsets = [8, 0], sizes = [8, 64], strides = [1, 1]} : vector<16x64xf32> to vector<8x64xf32>
    %85 = vector.extract_strided_slice %71 {offsets = [0, 0], sizes = [64, 8], strides = [1, 1]} : vector<256x8xf32> to vector<64x8xf32>
    %cst_75 = arith.constant dense<0.000000e+00> : vector<8x8xf32>
    %86 = tpu.matmul %84, %85, %cst_75 {dimension_numbers = #tpu.dot_dimension_numbers<[1], [0], [0], [1], [0, 0, 1, 1], [], []>} : vector<8x64xf32>, vector<64x8xf32>, vector<8x8xf32> -> vector<8x8xf32>
    %87 = vector.extract_strided_slice %15 {offsets = [8, 0], sizes = [8, 64], strides = [1, 1]} : vector<16x64xf32> to vector<8x64xf32>
    %88 = vector.extract_strided_slice %71 {offsets = [64, 0], sizes = [64, 8], strides = [1, 1]} : vector<256x8xf32> to vector<64x8xf32>
    %cst_76 = arith.constant dense<0.000000e+00> : vector<8x8xf32>
    %89 = tpu.matmul %87, %88, %cst_76 {dimension_numbers = #tpu.dot_dimension_numbers<[1], [0], [0], [1], [0, 0, 1, 1], [], []>} : vector<8x64xf32>, vector<64x8xf32>, vector<8x8xf32> -> vector<8x8xf32>
    %90 = vector.extract_strided_slice %22 {offsets = [8, 0], sizes = [8, 64], strides = [1, 1]} : vector<16x64xf32> to vector<8x64xf32>
    %91 = vector.extract_strided_slice %71 {offsets = [128, 0], sizes = [64, 8], strides = [1, 1]} : vector<256x8xf32> to vector<64x8xf32>
    %cst_77 = arith.constant dense<0.000000e+00> : vector<8x8xf32>
    %92 = tpu.matmul %90, %91, %cst_77 {dimension_numbers = #tpu.dot_dimension_numbers<[1], [0], [0], [1], [0, 0, 1, 1], [], []>} : vector<8x64xf32>, vector<64x8xf32>, vector<8x8xf32> -> vector<8x8xf32>
    %93 = vector.extract_strided_slice %29 {offsets = [8, 0], sizes = [8, 64], strides = [1, 1]} : vector<16x64xf32> to vector<8x64xf32>
    %94 = vector.extract_strided_slice %71 {offsets = [192, 0], sizes = [64, 8], strides = [1, 1]} : vector<256x8xf32> to vector<64x8xf32>
    %cst_78 = arith.constant dense<0.000000e+00> : vector<8x8xf32>
    %95 = tpu.matmul %93, %94, %cst_78 {dimension_numbers = #tpu.dot_dimension_numbers<[1], [0], [0], [1], [0, 0, 1, 1], [], []>} : vector<8x64xf32>, vector<64x8xf32>, vector<8x8xf32> -> vector<8x8xf32>
    %96 = tpu.concatenate %74, %77, %80, %83, %86, %89, %92, %95 in 0 : vector<8x8xf32>, vector<8x8xf32>, vector<8x8xf32>, vector<8x8xf32>, vector<8x8xf32>, vector<8x8xf32>, vector<8x8xf32>, vector<8x8xf32> -> vector<64x8xf32>
    %cst_79 = arith.constant dense<0xFF800000> : vector<64xf32>
    %97 = vector.multi_reduction <maximumf>, %96, %cst_79 [1] : vector<64x8xf32> to vector<64xf32>
    %98 = vector.shape_cast %97 : vector<64xf32> to vector<64x1xf32>
    %99 = vector.broadcast %98 : vector<64x1xf32> to vector<64x8xf32>
    %100 = arith.subf %96, %99 : vector<64x8xf32>
    %101 = math.exp %100 : vector<64x8xf32>
    %cst_80 = arith.constant dense<0.000000e+00> : vector<64xf32>
    %102 = vector.multi_reduction <add>, %101, %cst_80 [1] : vector<64x8xf32> to vector<64xf32>
    %103 = vector.shape_cast %102 : vector<64xf32> to vector<64x1xf32>
    %104 = tpu.reciprocal %103 {approx = true} : vector<64x1xf32> -> vector<64x1xf32>
    %105 = vector.broadcast %104 : vector<64x1xf32> to vector<64x8xf32>
    %106 = arith.mulf %101, %105 : vector<64x8xf32>
    %c0_81 = arith.constant 0 : index
    %c0_82 = arith.constant 0 : index
    %107 = vector.load %arg10[%c0_81, %c0_82] : memref<1x32xf32, #tpu.memory_space<vmem>>, vector<1x32xf32>
    %108 = vector.broadcast %107 : vector<1x32xf32> to vector<16x32xf32>
    %109 = arith.addf %0, %108 : vector<16x32xf32>
    %110 = vector.extract_strided_slice %106 {offsets = [0, 0], sizes = [8, 8], strides = [1, 1]} : vector<64x8xf32> to vector<8x8xf32>
    %111 = vector.extract_strided_slice %36 {offsets = [0, 0], sizes = [8, 64], strides = [1, 1]} : vector<16x64xf32> to vector<8x64xf32>
    %cst_83 = arith.constant dense<0.000000e+00> : vector<8x64xf32>
    %112 = tpu.matmul %110, %111, %cst_83 {dimension_numbers = #tpu.dot_dimension_numbers<[1], [0], [0], [1], [0, 0, 1, 1], [], []>} : vector<8x8xf32>, vector<8x64xf32>, vector<8x64xf32> -> vector<8x64xf32>
    %113 = vector.extract_strided_slice %106 {offsets = [32, 0], sizes = [8, 8], strides = [1, 1]} : vector<64x8xf32> to vector<8x8xf32>
    %114 = vector.extract_strided_slice %36 {offsets = [8, 0], sizes = [8, 64], strides = [1, 1]} : vector<16x64xf32> to vector<8x64xf32>
    %cst_84 = arith.constant dense<0.000000e+00> : vector<8x64xf32>
    %115 = tpu.matmul %113, %114, %cst_84 {dimension_numbers = #tpu.dot_dimension_numbers<[1], [0], [0], [1], [0, 0, 1, 1], [], []>} : vector<8x8xf32>, vector<8x64xf32>, vector<8x64xf32> -> vector<8x64xf32>
    %116 = tpu.concatenate %112, %115 in 0 : vector<8x64xf32>, vector<8x64xf32> -> vector<16x64xf32>
    %c0_85 = arith.constant 0 : index
    %c0_86 = arith.constant 0 : index
    %c0_87 = arith.constant 0 : index
    %117 = vector.load %arg9[%c0_85, %c0_86, %c0_87] : memref<4x64x32xf32, #tpu.memory_space<vmem>>, vector<1x64x32xf32>
    %118 = vector.shape_cast %117 : vector<1x64x32xf32> to vector<64x32xf32>
    %cst_88 = arith.constant dense<0.000000e+00> : vector<16x32xf32>
    %119 = tpu.matmul %116, %118, %cst_88 {dimension_numbers = #tpu.dot_dimension_numbers<[1], [0], [0], [1], [0, 0, 1, 1], [], []>} : vector<16x64xf32>, vector<64x32xf32>, vector<16x32xf32> -> vector<16x32xf32>
    %120 = arith.addf %109, %119 : vector<16x32xf32>
    %121 = vector.extract_strided_slice %106 {offsets = [8, 0], sizes = [8, 8], strides = [1, 1]} : vector<64x8xf32> to vector<8x8xf32>
    %122 = vector.extract_strided_slice %43 {offsets = [0, 0], sizes = [8, 64], strides = [1, 1]} : vector<16x64xf32> to vector<8x64xf32>
    %cst_89 = arith.constant dense<0.000000e+00> : vector<8x64xf32>
    %123 = tpu.matmul %121, %122, %cst_89 {dimension_numbers = #tpu.dot_dimension_numbers<[1], [0], [0], [1], [0, 0, 1, 1], [], []>} : vector<8x8xf32>, vector<8x64xf32>, vector<8x64xf32> -> vector<8x64xf32>
    %124 = vector.extract_strided_slice %106 {offsets = [40, 0], sizes = [8, 8], strides = [1, 1]} : vector<64x8xf32> to vector<8x8xf32>
    %125 = vector.extract_strided_slice %43 {offsets = [8, 0], sizes = [8, 64], strides = [1, 1]} : vector<16x64xf32> to vector<8x64xf32>
    %cst_90 = arith.constant dense<0.000000e+00> : vector<8x64xf32>
    %126 = tpu.matmul %124, %125, %cst_90 {dimension_numbers = #tpu.dot_dimension_numbers<[1], [0], [0], [1], [0, 0, 1, 1], [], []>} : vector<8x8xf32>, vector<8x64xf32>, vector<8x64xf32> -> vector<8x64xf32>
    %127 = tpu.concatenate %123, %126 in 0 : vector<8x64xf32>, vector<8x64xf32> -> vector<16x64xf32>
    %c1_91 = arith.constant 1 : index
    %c0_92 = arith.constant 0 : index
    %c0_93 = arith.constant 0 : index
    %128 = vector.load %arg9[%c1_91, %c0_92, %c0_93] : memref<4x64x32xf32, #tpu.memory_space<vmem>>, vector<1x64x32xf32>
    %129 = vector.shape_cast %128 : vector<1x64x32xf32> to vector<64x32xf32>
    %cst_94 = arith.constant dense<0.000000e+00> : vector<16x32xf32>
    %130 = tpu.matmul %127, %129, %cst_94 {dimension_numbers = #tpu.dot_dimension_numbers<[1], [0], [0], [1], [0, 0, 1, 1], [], []>} : vector<16x64xf32>, vector<64x32xf32>, vector<16x32xf32> -> vector<16x32xf32>
    %131 = arith.addf %120, %130 : vector<16x32xf32>
    %132 = vector.extract_strided_slice %106 {offsets = [16, 0], sizes = [8, 8], strides = [1, 1]} : vector<64x8xf32> to vector<8x8xf32>
    %133 = vector.extract_strided_slice %50 {offsets = [0, 0], sizes = [8, 64], strides = [1, 1]} : vector<16x64xf32> to vector<8x64xf32>
    %cst_95 = arith.constant dense<0.000000e+00> : vector<8x64xf32>
    %134 = tpu.matmul %132, %133, %cst_95 {dimension_numbers = #tpu.dot_dimension_numbers<[1], [0], [0], [1], [0, 0, 1, 1], [], []>} : vector<8x8xf32>, vector<8x64xf32>, vector<8x64xf32> -> vector<8x64xf32>
    %135 = vector.extract_strided_slice %106 {offsets = [48, 0], sizes = [8, 8], strides = [1, 1]} : vector<64x8xf32> to vector<8x8xf32>
    %136 = vector.extract_strided_slice %50 {offsets = [8, 0], sizes = [8, 64], strides = [1, 1]} : vector<16x64xf32> to vector<8x64xf32>
    %cst_96 = arith.constant dense<0.000000e+00> : vector<8x64xf32>
    %137 = tpu.matmul %135, %136, %cst_96 {dimension_numbers = #tpu.dot_dimension_numbers<[1], [0], [0], [1], [0, 0, 1, 1], [], []>} : vector<8x8xf32>, vector<8x64xf32>, vector<8x64xf32> -> vector<8x64xf32>
    %138 = tpu.concatenate %134, %137 in 0 : vector<8x64xf32>, vector<8x64xf32> -> vector<16x64xf32>
    %c2_97 = arith.constant 2 : index
    %c0_98 = arith.constant 0 : index
    %c0_99 = arith.constant 0 : index
    %139 = vector.load %arg9[%c2_97, %c0_98, %c0_99] : memref<4x64x32xf32, #tpu.memory_space<vmem>>, vector<1x64x32xf32>
    %140 = vector.shape_cast %139 : vector<1x64x32xf32> to vector<64x32xf32>
    %cst_100 = arith.constant dense<0.000000e+00> : vector<16x32xf32>
    %141 = tpu.matmul %138, %140, %cst_100 {dimension_numbers = #tpu.dot_dimension_numbers<[1], [0], [0], [1], [0, 0, 1, 1], [], []>} : vector<16x64xf32>, vector<64x32xf32>, vector<16x32xf32> -> vector<16x32xf32>
    %142 = arith.addf %131, %141 : vector<16x32xf32>
    %143 = vector.extract_strided_slice %106 {offsets = [24, 0], sizes = [8, 8], strides = [1, 1]} : vector<64x8xf32> to vector<8x8xf32>
    %144 = vector.extract_strided_slice %57 {offsets = [0, 0], sizes = [8, 64], strides = [1, 1]} : vector<16x64xf32> to vector<8x64xf32>
    %cst_101 = arith.constant dense<0.000000e+00> : vector<8x64xf32>
    %145 = tpu.matmul %143, %144, %cst_101 {dimension_numbers = #tpu.dot_dimension_numbers<[1], [0], [0], [1], [0, 0, 1, 1], [], []>} : vector<8x8xf32>, vector<8x64xf32>, vector<8x64xf32> -> vector<8x64xf32>
    %146 = vector.extract_strided_slice %106 {offsets = [56, 0], sizes = [8, 8], strides = [1, 1]} : vector<64x8xf32> to vector<8x8xf32>
    %147 = vector.extract_strided_slice %57 {offsets = [8, 0], sizes = [8, 64], strides = [1, 1]} : vector<16x64xf32> to vector<8x64xf32>
    %cst_102 = arith.constant dense<0.000000e+00> : vector<8x64xf32>
    %148 = tpu.matmul %146, %147, %cst_102 {dimension_numbers = #tpu.dot_dimension_numbers<[1], [0], [0], [1], [0, 0, 1, 1], [], []>} : vector<8x8xf32>, vector<8x64xf32>, vector<8x64xf32> -> vector<8x64xf32>
    %149 = tpu.concatenate %145, %148 in 0 : vector<8x64xf32>, vector<8x64xf32> -> vector<16x64xf32>
    %c3_103 = arith.constant 3 : index
    %c0_104 = arith.constant 0 : index
    %c0_105 = arith.constant 0 : index
    %150 = vector.load %arg9[%c3_103, %c0_104, %c0_105] : memref<4x64x32xf32, #tpu.memory_space<vmem>>, vector<1x64x32xf32>
    %151 = vector.shape_cast %150 : vector<1x64x32xf32> to vector<64x32xf32>
    %cst_106 = arith.constant dense<0.000000e+00> : vector<16x32xf32>
    %152 = tpu.matmul %149, %151, %cst_106 {dimension_numbers = #tpu.dot_dimension_numbers<[1], [0], [0], [1], [0, 0, 1, 1], [], []>} : vector<16x64xf32>, vector<64x32xf32>, vector<16x32xf32> -> vector<16x32xf32>
    %153 = arith.addf %142, %152 : vector<16x32xf32>
    %cst_107 = arith.constant 0.000000e+00 : f32
    %154 = vector.broadcast %cst_107 : f32 to vector<16x32xf32>
    %155 = arith.maximumf %153, %154 : vector<16x32xf32>
    %c0_108 = arith.constant 0 : index
    %c0_109 = arith.constant 0 : index
    %156 = vector.load %arg13[%c0_108, %c0_109] : memref<1x32xf32, #tpu.memory_space<vmem>>, vector<1x32xf32>
    %c0_110 = arith.constant 0 : index
    %c0_111 = arith.constant 0 : index
    %157 = vector.load %arg14[%c0_110, %c0_111] : memref<1x32xf32, #tpu.memory_space<vmem>>, vector<1x32xf32>
    %cst_112 = arith.constant dense<0.000000e+00> : vector<16xf32>
    %158 = vector.multi_reduction <add>, %155, %cst_112 [1] : vector<16x32xf32> to vector<16xf32>
    %159 = vector.shape_cast %158 : vector<16xf32> to vector<16x1xf32>
    %cst_113 = arith.constant 3.200000e+01 : f32
    %160 = vector.broadcast %cst_113 : f32 to vector<16x1xf32>
    %161 = arith.divf %159, %160 : vector<16x1xf32>
    %162 = vector.broadcast %161 : vector<16x1xf32> to vector<16x32xf32>
    %163 = arith.subf %155, %162 : vector<16x32xf32>
    %164 = arith.mulf %163, %163 : vector<16x32xf32>
    %cst_114 = arith.constant dense<0.000000e+00> : vector<16xf32>
    %165 = vector.multi_reduction <add>, %164, %cst_114 [1] : vector<16x32xf32> to vector<16xf32>
    %166 = vector.shape_cast %165 : vector<16xf32> to vector<16x1xf32>
    %cst_115 = arith.constant 3.200000e+01 : f32
    %167 = vector.broadcast %cst_115 : f32 to vector<16x1xf32>
    %168 = arith.divf %166, %167 : vector<16x1xf32>
    %169 = vector.broadcast %161 : vector<16x1xf32> to vector<16x32xf32>
    %170 = arith.subf %155, %169 : vector<16x32xf32>
    %cst_116 = arith.constant 9.99999997E-7 : f32
    %171 = vector.broadcast %cst_116 : f32 to vector<16x1xf32>
    %172 = arith.addf %168, %171 : vector<16x1xf32>
    %173 = math.rsqrt %172 : vector<16x1xf32>
    %174 = vector.broadcast %173 : vector<16x1xf32> to vector<16x32xf32>
    %175 = arith.mulf %170, %174 : vector<16x32xf32>
    %176 = vector.broadcast %156 : vector<1x32xf32> to vector<16x32xf32>
    %177 = arith.mulf %175, %176 : vector<16x32xf32>
    %178 = vector.broadcast %157 : vector<1x32xf32> to vector<16x32xf32>
    %179 = arith.addf %177, %178 : vector<16x32xf32>
    %c0_117 = arith.constant 0 : index
    %c0_118 = arith.constant 0 : index
    %180 = vector.load %arg11[%c0_117, %c0_118] : memref<32x32xf32, #tpu.memory_space<vmem>>, vector<32x32xf32>
    %cst_119 = arith.constant dense<0.000000e+00> : vector<16x32xf32>
    %181 = tpu.matmul %179, %180, %cst_119 {dimension_numbers = #tpu.dot_dimension_numbers<[1], [0], [0], [1], [0, 0, 1, 1], [], []>} : vector<16x32xf32>, vector<32x32xf32>, vector<16x32xf32> -> vector<16x32xf32>
    %c0_120 = arith.constant 0 : index
    %c0_121 = arith.constant 0 : index
    %182 = vector.load %arg12[%c0_120, %c0_121] : memref<1x32xf32, #tpu.memory_space<vmem>>, vector<1x32xf32>
    %183 = vector.broadcast %182 : vector<1x32xf32> to vector<16x32xf32>
    %184 = arith.addf %181, %183 : vector<16x32xf32>
    %185 = arith.addf %184, %179 : vector<16x32xf32>
    %cst_122 = arith.constant 0.000000e+00 : f32
    %186 = vector.broadcast %cst_122 : f32 to vector<16x32xf32>
    %187 = arith.maximumf %185, %186 : vector<16x32xf32>
    %c0_123 = arith.constant 0 : index
    %c0_124 = arith.constant 0 : index
    %188 = vector.load %arg15[%c0_123, %c0_124] : memref<1x32xf32, #tpu.memory_space<vmem>>, vector<1x32xf32>
    %c0_125 = arith.constant 0 : index
    %c0_126 = arith.constant 0 : index
    %189 = vector.load %arg16[%c0_125, %c0_126] : memref<1x32xf32, #tpu.memory_space<vmem>>, vector<1x32xf32>
    %cst_127 = arith.constant dense<0.000000e+00> : vector<16xf32>
    %190 = vector.multi_reduction <add>, %187, %cst_127 [1] : vector<16x32xf32> to vector<16xf32>
    %191 = vector.shape_cast %190 : vector<16xf32> to vector<16x1xf32>
    %cst_128 = arith.constant 3.200000e+01 : f32
    %192 = vector.broadcast %cst_128 : f32 to vector<16x1xf32>
    %193 = arith.divf %191, %192 : vector<16x1xf32>
    %194 = vector.broadcast %193 : vector<16x1xf32> to vector<16x32xf32>
    %195 = arith.subf %187, %194 : vector<16x32xf32>
    %196 = arith.mulf %195, %195 : vector<16x32xf32>
    %cst_129 = arith.constant dense<0.000000e+00> : vector<16xf32>
    %197 = vector.multi_reduction <add>, %196, %cst_129 [1] : vector<16x32xf32> to vector<16xf32>
    %198 = vector.shape_cast %197 : vector<16xf32> to vector<16x1xf32>
    %cst_130 = arith.constant 3.200000e+01 : f32
    %199 = vector.broadcast %cst_130 : f32 to vector<16x1xf32>
    %200 = arith.divf %198, %199 : vector<16x1xf32>
    %201 = vector.broadcast %193 : vector<16x1xf32> to vector<16x32xf32>
    %202 = arith.subf %187, %201 : vector<16x32xf32>
    %cst_131 = arith.constant 9.99999997E-7 : f32
    %203 = vector.broadcast %cst_131 : f32 to vector<16x1xf32>
    %204 = arith.addf %200, %203 : vector<16x1xf32>
    %205 = math.rsqrt %204 : vector<16x1xf32>
    %206 = vector.broadcast %205 : vector<16x1xf32> to vector<16x32xf32>
    %207 = arith.mulf %202, %206 : vector<16x32xf32>
    %208 = vector.broadcast %188 : vector<1x32xf32> to vector<16x32xf32>
    %209 = arith.mulf %207, %208 : vector<16x32xf32>
    %210 = vector.broadcast %189 : vector<1x32xf32> to vector<16x32xf32>
    %211 = arith.addf %209, %210 : vector<16x32xf32>
    %c0_132 = arith.constant 0 : index
    %c0_133 = arith.constant 0 : index
    %212 = vector.load %arg17[%c0_132, %c0_133] : memref<16x32xf32, #tpu.memory_space<vmem>>, vector<16x32xf32>
    tpu.vector_store %arg17[%c0_132, %c0_133], %211 {strides = array<i32>} : memref<16x32xf32, #tpu.memory_space<vmem>>, vector<16x32xf32>,
    return
  }
}

</mosaic_0001>

<bundles_post_ra>
// kernel: tpu_custom_call.1
= control target key start
LH: loop header
LB: loop body
LE: loop exit
PB: predicated region body
PF: predicated region fallthrough
CT: control target
= control target key end

     0   :  { %s3119_s0 = inlined_call_operand.vmem [shape: f32[16,32], index: 0, kind: input, shape index: {}]   ;;  %s3120_s1 = inlined_call_operand.vmem [shape: f32[2,48,8], index: 1, kind: input, shape index: {}]   ;;  %s3121_s2 = inlined_call_operand.vmem [shape: f32[16,48], index: 2, kind: input, shape index: {}]   ;;  %s3122_s3 = inlined_call_operand.vmem [shape: f32[4,32,64], index: 3, kind: input, shape index: {}]   ;;  %s3123_s4 = inlined_call_operand.vmem [shape: f32[4,1,64], index: 4, kind: input, shape index: {}]   ;;  %s3124_s5 = inlined_call_operand.vmem [shape: f32[256,48], index: 5, kind: input, shape index: {}]   ;;  %s3125_s6 = inlined_call_operand.vmem [shape: f32[256,1], index: 6, kind: input, shape index: {}]   ;;  %s3126_s7 = inlined_call_operand.vmem [shape: f32[4,48,64], index: 7, kind: input, shape index: {}]   ;;  %s3127_s8 = inlined_call_operand.vmem [shape: f32[4,1,64], index: 8, kind: input, shape index: {}]   ;;  %s3128_s9 = inlined_call_operand.vmem [shape: f32[4,64,32], index: 9, kind: input, shape index: {}]   ;;  %s3129_s10 = inlined_call_operand.vmem [shape: f32[1,32], index: 10, kind: input, shape index: {}]   ;;  %s3130_s11 = inlined_call_operand.vmem [shape: f32[32,32], index: 11, kind: input, shape index: {}]   ;;  %s3131_s12 = inlined_call_operand.vmem [shape: f32[1,32], index: 12, kind: input, shape index: {}]   ;;  %s3132_s13 = inlined_call_operand.vmem [shape: f32[1,32], index: 13, kind: input, shape index: {}]   ;;  %s3133_s14 = inlined_call_operand.vmem [shape: f32[1,32], index: 14, kind: input, shape index: {}]   ;;  %s3134_s15 = inlined_call_operand.vmem [shape: f32[1,32], index: 15, kind: input, shape index: {}]   ;;  %s3135_s16 = inlined_call_operand.vmem [shape: f32[1,32], index: 16, kind: input, shape index: {}]   ;;  %s3136_s17 = inlined_call_operand.hbm [shape: f32[16,32], index: 17, kind: output, shape index: {}]  }
   0x1   :  { %3140 = sst [smem:[#allocation22_spill]] %s3119_s0 }
   0x2   :  { %3141 = sst [smem:[#allocation23_spill]] %s3120_s1 }
   0x3   :  { %v64_v0 = vld [vmem:[%s3122_s3 + $0x18] sm:$0xff]  ;;  %v63_v2 = vld [vmem:[%s3122_s3 + $0x10] sm:$0xff]  ;;  %v62_v4 = vld [vmem:[%s3122_s3 + $0x8] sm:$0xff]  ;;  %v1983_v6 = vmov 0   ;;  %s3142_s27 = sld [smem:[#allocation22_spill]]  ;;  %vm69_vm0 = vcmask 261120  }
   0x4   :  { %v1712_v1 = vld [vmem:[%s3122_s3 + $0x38] sm:$0xff]  ;;  %88 = vmatpush.msra.mxu0 %v64_v0  ;;  %v1711_v3 = vld [vmem:[%s3122_s3 + $0x30] sm:$0xff]  ;;  %v1710_v5 = vld [vmem:[%s3122_s3 + $0x28] sm:$0xff]  ;;  %1897 = vset.pattern.permute.xlu1 %v1983_v6  ;;  %s3143_s18 = sld [smem:[#allocation23_spill]] }
   0x5   :  { %121 = vmatpush.msra.mxu1 %v1712_v1  ;;  %1896 = vset.pattern.permute.xlu0 %v1983_v6  ;;  %v61_v7 = vld [vmem:[%s3122_s3] sm:$0xff]  ;;  %v203_v10 = vld [vmem:[%s3126_s7 + $0x28] sm:$0xff]  ;;  %v1737_v11 = vld [vmem:[%s3126_s7 + $0x58] sm:$0xff] }
   0x6   :  { %89 = vmatpush.msra.mxu0 %v63_v2  ;;  %v1709_v8 = vld [vmem:[%s3122_s3 + $0x20] sm:$0xff]  ;;  %1898 = vset.pattern.permute.xlu2 %v1983_v6  ;;  %v386_v12 = vld [vmem:[%s3125_s6 + $0x28] sm:$0xff]  ;;  %v1736_v14 = vld [vmem:[%s3126_s7 + $0x50] sm:$0xff] }
   0x7   :  { %122 = vmatpush.msra.mxu1 %v1711_v3  ;;  %v202_v13 = vld [vmem:[%s3126_s7 + $0x20] sm:$0xff]  ;;  %v201_v15 = vld [vmem:[%s3126_s7 + $0x18] sm:$0xff]  ;;  %v1735_v16 = vld [vmem:[%s3126_s7 + $0x48] sm:$0xff]  ;;  %440 = vperm.xlu1 %1897, %v386_v12  }
   0x8   :  { %90 = vmatpush.msra.mxu0 %v62_v4  ;;  %v200_v18 = vld [vmem:[%s3126_s7 + $0x10] sm:$0xff]  ;;  %v1734_v19 = vld [vmem:[%s3126_s7 + $0x40] sm:$0xff]  ;;  %v199_v20 = vld [vmem:[%s3126_s7 + $0x8] sm:$0xff] }
   0x9   :  { %123 = vmatpush.msra.mxu1 %v1710_v5  ;;  %v2105_v9 = vld [vmem:[%s3142_s27] sm:$0xff]  ;;  %v2135_v17 = vld [vmem:[%s3142_s27 + $0x8] sm:$0xff]  ;;  %v1733_v21 = vld [vmem:[%s3126_s7 + $0x38] sm:$0xff] }
   0xa   :  { %91 = vmatpush.msra.mxu0 %v61_v7  ;;  %v385_v22 = vld [vmem:[%s3125_s6 + $0x20] sm:$0xff]  ;;  %v1732_v24 = vld [vmem:[%s3126_s7 + $0x30] sm:$0xff]  ;;  %v2165_v25 = vld [vmem:[%s3143_s18 + $0x28] sm:$0xff] }
   0xb   :  { %124 = vmatpush.msra.mxu1 %v1709_v8  ;;  %1707 = vmatmul.msk.f32.vlgmr.msra.gmra.mxu0 %vm69_vm0, %v2105_v9  ;;  %v198_v23 = vld [vmem:[%s3126_s7] sm:$0xff]  ;;  %v2170_v26 = vld [vmem:[%s3143_s18 + $0x58] sm:$0xff]  ;;  %v2183_v29 = vld [vmem:[%s3143_s18 + $0x50] sm:$0xff] }
   0xc   :  { %1714 = vmatmul.msk.f32.vlgmr.msra.gmra.mxu1 %vm69_vm0, %v2105_v9  ;;  %225 = vmatpush.msrb.mxu0 %v203_v10  ;;  %v388_v27 = vld [vmem:[%s3125_s6 + $0x38] sm:$0xff]  ;;  %v2178_v28 = vld [vmem:[%s3143_s18 + $0x20] sm:$0xff] }
   0xd   :  { %260 = vmatpush.msrb.mxu1 %v1737_v11  ;;  %450 = vperm.xlu0 %1896, %v388_v27  }
   0xe   :  { %226 = vmatpush.msrb.mxu0 %v202_v13 }
   0xf   :  { %261 = vmatpush.msrb.mxu1 %v1736_v14  ;;  %435 = vperm.xlu1 %1897, %v385_v22  }
  0x10   :  { %227 = vmatpush.msrb.mxu0 %v201_v15 }
  0x11   :  { %262 = vmatpush.msrb.mxu1 %v1735_v16 }
  0x12   :  { %228 = vmatpush.msrb.mxu0 %v200_v18 }
  0x13   :  { %263 = vmatpush.msrb.mxu1 %v1734_v19  ;;  %1708 = vmatmul.msk.f32.gmra.mxu0 %vm69_vm0, %v2135_v17 }
  0x14   :  { %1715 = vmatmul.msk.f32.gmra.mxu1 %vm69_vm0, %v2135_v17  ;;  %229 = vmatpush.msrb.mxu0 %v199_v20 }
  0x15   :  { %264 = vmatpush.msrb.mxu1 %v1733_v21 }
  0x16   :  { %230 = vmatpush.msrb.mxu0 %v198_v23 }
  0x17   :  { %265 = vmatpush.msrb.mxu1 %v1732_v24 }
  0x18   :  { %22 = vsyncpa [#allocation3], 0  ;;  %679 = vmatpush.msra.mxu0 %v2165_v25  ;;  %v2190_v30 = vld [vmem:[%s3121_s2] sm:$0xff]  ;;  %vm208_vm1 = vcmask 392192   ;;  %v2197_v31 = vld [vmem:[%s3143_s18 + $0x18] sm:$0xff]  ;;  %vm902_vm2 = vcmask 523264  }
  0x19   :  { %799 = vmatpush.msra.mxu1 %v2170_v26  ;;  %v2202_v32 = vld [vmem:[%s3143_s18 + $0x48] sm:$0xff]  ;;  %v403_v33 = vld [vmem:[%s3125_s6 + $0xb0] sm:$0xff]  ;;  %v2219_v35 = vld [vmem:[%s3143_s18 + $0x40] sm:$0xff]  ;;  %vm1087_vm3 = vcmask 64512   ;;  %s1695_s28 = sshll.u32 %s3136_s17, 4  ;;  %s1696_s28 = int_to_ptr.hbm [resolvable:$true] %s1695_s28 }
  0x1a   :  { %680 = vmatpush.msra.mxu0 %v2178_v28  ;;  %v2214_v34 = vld [vmem:[%s3143_s18 + $0x10] sm:$0xff]  ;;  %v2229_v37 = vld [vmem:[%s3143_s18 + $0x8] sm:$0xff]  ;;  %v2234_v38 = vld [vmem:[%s3143_s18 + $0x38] sm:$0xff]  ;;  %525 = vperm.xlu1 %1897, %v403_v33  }
  0x1b   :  { %800 = vmatpush.msra.mxu1 %v2183_v29  ;;  %1730 = vmatmul.msk.f32.vlgmr.msrb.gmra.mxu0 %vm208_vm1, %v2190_v30  ;;  %v387_v36 = vld [vmem:[%s3125_s6 + $0x30] sm:$0xff]  ;;  %v2241_v39 = vld [vmem:[%s3143_s18] sm:$0xff]  ;;  %v2251_v41 = vld [vmem:[%s3121_s2 + $0x8] sm:$0xff] }
  0x1c   :  { %1739 = vmatmul.msk.f32.vlgmr.msrb.gmra.mxu1 %vm208_vm1, %v2190_v30  ;;  %681 = vmatpush.msra.mxu0 %v2197_v31  ;;  %v2246_v40 = vld [vmem:[%s3143_s18 + $0x30] sm:$0xff]  ;;  %v381_v42 = vld [vmem:[%s3125_s6] sm:$0xff]  ;;  %v384_v43 = vld [vmem:[%s3125_s6 + $0x18] sm:$0xff] }
  0x1d   :  { %801 = vmatpush.msra.mxu1 %v2202_v32  ;;  %445 = vperm.xlu0 %1896, %v387_v36   ;;  %v383_v44 = vld [vmem:[%s3125_s6 + $0x10] sm:$0xff]  ;;  %v343_v45 = vld [vmem:[%s3124_s5] sm:$0xff]  ;;  %v1719_v46 = vld [vmem:[%s3122_s3 + $0x58] sm:$0xff] }
  0x1e   :  { %682 = vmatpush.msra.mxu0 %v2214_v34  ;;  %430 = vperm.xlu2 %1898, %v384_v43   ;;  %v1726_v47 = vld [vmem:[%s3122_s3 + $0x78] sm:$0xff]  ;;  %v1718_v49 = vld [vmem:[%s3122_s3 + $0x50] sm:$0xff]  ;;  %v1717_v51 = vld [vmem:[%s3122_s3 + $0x48] sm:$0xff] }
  0x1f   :  { %802 = vmatpush.msra.mxu1 %v2219_v35  ;;  %v404_v48 = vld [vmem:[%s3125_s6 + $0xb8] sm:$0xff]  ;;  %154 = vmatpush.msra.mxu2 %v1719_v46  ;;  %v1725_v50 = vld [vmem:[%s3122_s3 + $0x70] sm:$0xff]  ;;  %v1724_v52 = vld [vmem:[%s3122_s3 + $0x68] sm:$0xff] }
  0x20   :  { %683 = vmatpush.msra.mxu0 %v2229_v37  ;;  %187 = vmatpush.msra.mxu3 %v1726_v47  ;;  %v1716_v53 = vld [vmem:[%s3122_s3 + $0x40] sm:$0xff]  ;;  %v344_v55 = vld [vmem:[%s3124_s5 + $0x8] sm:$0xff]  ;;  %v1755_v59 = vld [vmem:[%s3126_s7 + $0xb8] sm:$0xff] }
  0x21   :  { %803 = vmatpush.msra.mxu1 %v2234_v38  ;;  %155 = vmatpush.msra.mxu2 %v1718_v49  ;;  %v1723_v54 = vld [vmem:[%s3122_s3 + $0x60] sm:$0xff]  ;;  %v402_v56 = vld [vmem:[%s3125_s6 + $0xa8] sm:$0xff]  ;;  %v1754_v61 = vld [vmem:[%s3126_s7 + $0xb0] sm:$0xff] }
  0x22   :  { %684 = vmatpush.msra.mxu0 %v2241_v39  ;;  %415 = vperm.xlu1 %1897, %v381_v42   ;;  %v382_v57 = vld [vmem:[%s3125_s6 + $0x8] sm:$0xff]  ;;  %v1745_v60 = vld [vmem:[%s3126_s7 + $0x80] sm:$0xff]  ;;  %v345_v62 = vld [vmem:[%s3124_s5 + $0x10] sm:$0xff] }
  0x23   :  { %804 = vmatpush.msra.mxu1 %v2246_v40  ;;  %1731 = vmatmul.msk.f32.gmra.mxu0 %vm208_vm1, %v2251_v41  ;;  %v1746_v58 = vld [vmem:[%s3126_s7 + $0x88] sm:$0xff]  ;;  %v1744_v63 = vld [vmem:[%s3126_s7 + $0x78] sm:$0xff]  ;;  %v1743_v2 = vld [vmem:[%s3126_s7 + $0x70] sm:$0xff] }
  0x24   :  { %1740 = vmatmul.msk.f32.gmra.mxu1 %vm208_vm1, %v2251_v41  ;;  %188 = vmatpush.msra.mxu3 %v1725_v50  ;;  %v1753_v0 = vld [vmem:[%s3126_s7 + $0xa8] sm:$0xff]  ;;  %v396_v1 = vld [vmem:[%s3125_s6 + $0x78] sm:$0xff]  ;;  %v1752_v3 = vld [vmem:[%s3126_s7 + $0xa0] sm:$0xff] }
  0x25   :  { %425 = vperm.xlu0 %1896, %v383_v44   ;;  %156 = vmatpush.msra.mxu2 %v1717_v51  ;;  %v1742_v4 = vld [vmem:[%s3126_s7 + $0x68] sm:$0xff]  ;;  %v1751_v5 = vld [vmem:[%s3126_s7 + $0x98] sm:$0xff]  ;;  %v1741_v7 = vld [vmem:[%s3126_s7 + $0x60] sm:$0xff] }
  0x26   :  { %530 = vperm.xlu2 %1898, %v404_v48   ;;  %189 = vmatpush.msra.mxu3 %v1724_v52  ;;  %v346_v6 = vld [vmem:[%s3124_s5 + $0x18] sm:$0xff]  ;;  %v1750_v8 = vld [vmem:[%s3126_s7 + $0x90] sm:$0xff]  ;;  %v401_v10 = vld [vmem:[%s3125_s6 + $0xa0] sm:$0xff] }
  0x27   :  { %157 = vmatpush.msra.mxu2 %v1716_v53  ;;  %v347_v11 = vld [vmem:[%s3124_s5 + $0x20] sm:$0xff]  ;;  %v395_v13 = vld [vmem:[%s3125_s6 + $0x70] sm:$0xff]  ;;  %v400_v14 = vld [vmem:[%s3125_s6 + $0x98] sm:$0xff] }
  0x28   :  { %190 = vmatpush.msra.mxu3 %v1723_v54  ;;  %1721 = vmatmul.msk.f32.vlgmr.msra.gmra.mxu2 %vm69_vm0, %v2105_v9  ;;  %v393_v12 = vld [vmem:[%s3125_s6 + $0x60] sm:$0xff]  ;;  %v348_v15 = vld [vmem:[%s3124_s5 + $0x28] sm:$0xff]  ;;  %v349_v20 = vld [vmem:[%s3124_s5 + $0x30] sm:$0xff] }
  0x29   :  { %1728 = vmatmul.msk.f32.vlgmr.msra.gmra.mxu3 %vm69_vm0, %v2105_v9  ;;  %295 = vmatpush.msrb.mxu2 %v1746_v58  ;;  %v399_v9 = vld [vmem:[%s3125_s6 + $0x90] sm:$0xff]  ;;  %v368_v16 = vld [vmem:[%s3124_s5 + $0xc8] sm:$0xff]  ;;  %v392_v23 = vld [vmem:[%s3125_s6 + $0x58] sm:$0xff] }
  0x2a   :  { %330 = vmatpush.msrb.mxu3 %v1755_v59  ;;  %510 = vperm.xlu1 %1897, %v400_v14   ;;  %v398_v18 = vld [vmem:[%s3125_s6 + $0x88] sm:$0xff]  ;;  %v369_v21 = vld [vmem:[%s3124_s5 + $0xd0] sm:$0xff]  ;;  %v397_v24 = vld [vmem:[%s3125_s6 + $0x80] sm:$0xff] }
  0x2b   :  { %1759 = vmatmul.msk.f32.vlgmr.msra.gmra.mxu0 %vm208_vm1, %v343_v45  ;;  %296 = vmatpush.msrb.mxu2 %v1745_v60  ;;  %v394_v19 = vld [vmem:[%s3125_s6 + $0x68] sm:$0xff]  ;;  %v411_v27 = vld [vmem:[%s3125_s6 + $0xf0] sm:$0xff]  ;;  %v354_v36 = vld [vmem:[%s3124_s5 + $0x58] sm:$0xff] }
  0x2c   :  { %1797 = vmatmul.msk.f32.vlgmr.msra.gmra.mxu1 %vm208_vm1, %v343_v45  ;;  %331 = vmatpush.msrb.mxu3 %v1754_v61  ;;  %v390_v22 = vld [vmem:[%s3125_s6 + $0x48] sm:$0xff]  ;;  %v409_v42 = vld [vmem:[%s3125_s6 + $0xe0] sm:$0xff]  ;;  %v408_v46 = vld [vmem:[%s3125_s6 + $0xd8] sm:$0xff] }
  0x2d   :  { %520 = vperm.xlu0 %1896, %v402_v56   ;;  %297 = vmatpush.msrb.mxu2 %v1744_v63  ;;  %v372_v33 = vld [vmem:[%s3124_s5 + $0xe8] sm:$0xff]  ;;  %v357_v50 = vld [vmem:[%s3124_s5 + $0x70] sm:$0xff]  ;;  %v405_v52 = vld [vmem:[%s3125_s6 + $0xc0] sm:$0xff] }
  0x2e   :  { %420 = vperm.xlu2 %1898, %v382_v57   ;;  %332 = vmatpush.msrb.mxu3 %v1753_v0  ;;  %v356_v45 = vld [vmem:[%s3124_s5 + $0x68] sm:$0xff]  ;;  %v359_v60 = vld [vmem:[%s3124_s5 + $0x80] sm:$0xff] }
  0x2f   :  { %298 = vmatpush.msrb.mxu2 %v1743_v2  ;;  %v406_v47 = vld [vmem:[%s3125_s6 + $0xc8] sm:$0xff] }
  0x30   :  { %1722 = vmatmul.msk.f32.gmra.mxu2 %vm69_vm0, %v2135_v17  ;;  %333 = vmatpush.msrb.mxu3 %v1752_v3  ;;  %v407_v3 = vld [vmem:[%s3125_s6 + $0xd0] sm:$0xff] }
  0x31   :  { %1729 = vmatmul.msk.f32.gmra.mxu3 %vm69_vm0, %v2135_v17  ;;  %299 = vmatpush.msrb.mxu2 %v1742_v4  ;;  %v412_v17 = vld [vmem:[%s3125_s6 + $0xf8] sm:$0xff] }
  0x32   :  { %334 = vmatpush.msrb.mxu3 %v1751_v5  ;;  %480 = vperm.xlu1 %1897, %v394_v19  }
  0x33   :  { %1760 = vmatmul.msk.f32.gmra.mxu0 %vm208_vm1, %v344_v55  ;;  %300 = vmatpush.msrb.mxu2 %v1741_v7 }
  0x34   :  { %1798 = vmatmul.msk.f32.gmra.mxu1 %vm208_vm1, %v344_v55  ;;  %335 = vmatpush.msrb.mxu3 %v1750_v8  ;;  %v358_v55 = vld [vmem:[%s3124_s5 + $0x78] sm:$0xff] }
  0x35   :  { %490 = vperm.xlu0 %1896, %v396_v1   ;;  %1885 = vmatpush.msra.mxu2 %v2170_v26  ;;  %v370_v26 = vld [vmem:[%s3124_s5 + $0xd8] sm:$0xff]  ;;  %v360_v1 = vld [vmem:[%s3124_s5 + $0x88] sm:$0xff] }
  0x36   :  { %515 = vperm.xlu2 %1898, %v401_v10   ;;  %1879 = vmatpush.msra.mxu3 %v2165_v25  ;;  %v350_v25 = vld [vmem:[%s3124_s5 + $0x38] sm:$0xff] }
  0x37   :  { %1886 = vmatpush.msra.mxu2 %v2183_v29  ;;  %v351_v29 = vld [vmem:[%s3124_s5 + $0x40] sm:$0xff] }
  0x38   :  { %1748 = vmatmul.msk.f32.vlgmr.msrb.gmra.mxu2 %vm208_vm1, %v2190_v30  ;;  %1880 = vmatpush.msra.mxu3 %v2178_v28  ;;  %v391_v28 = vld [vmem:[%s3125_s6 + $0x50] sm:$0xff] }
  0x39   :  { %1757 = vmatmul.msk.f32.vlgmr.msrb.gmra.mxu3 %vm208_vm1, %v2190_v30  ;;  %1887 = vmatpush.msra.mxu2 %v2202_v32  ;;  %v371_v30 = vld [vmem:[%s3124_s5 + $0xe0] sm:$0xff]  ;;  %v352_v32 = vld [vmem:[%s3124_s5 + $0x48] sm:$0xff] }
  0x3a   :  { %1881 = vmatpush.msra.mxu3 %v2197_v31  ;;  %495 = vperm.xlu1 %1897, %v397_v24   ;;  %v389_v31 = vld [vmem:[%s3125_s6 + $0x40] sm:$0xff] }
  0x3b   :  { %1761 = vmatmul.msk.f32.gmra.mxu0 %vm208_vm1, %v345_v62  ;;  %1888 = vmatpush.msra.mxu2 %v2219_v35  ;;  %v373_v35 = vld [vmem:[%s3124_s5 + $0xf0] sm:$0xff] }
  0x3c   :  { %1799 = vmatmul.msk.f32.gmra.mxu1 %vm208_vm1, %v345_v62  ;;  %1882 = vmatpush.msra.mxu3 %v2214_v34  ;;  %v353_v34 = vld [vmem:[%s3124_s5 + $0x50] sm:$0xff] }
  0x3d   :  { %505 = vperm.xlu0 %1896, %v399_v9   ;;  %1889 = vmatpush.msra.mxu2 %v2234_v38  ;;  %v361_v9 = vld [vmem:[%s3124_s5 + $0x90] sm:$0xff] }
  0x3e   :  { %485 = vperm.xlu2 %1898, %v395_v13   ;;  %1883 = vmatpush.msra.mxu3 %v2229_v37  ;;  %v374_v37 = vld [vmem:[%s3124_s5 + $0xf8] sm:$0xff] }
  0x3f   :  { %1890 = vmatpush.msra.mxu2 %v2246_v40  ;;  %v355_v40 = vld [vmem:[%s3124_s5 + $0x60] sm:$0xff] }
  0x40   :  { %1749 = vmatmul.msk.f32.gmra.mxu2 %vm208_vm1, %v2251_v41  ;;  %1884 = vmatpush.msra.mxu3 %v2241_v39 }
  0x41   :  { %1758 = vmatmul.msk.f32.gmra.mxu3 %vm208_vm1, %v2251_v41  ;;  %v410_v41 = vld [vmem:[%s3125_s6 + $0xe8] sm:$0xff] }
  0x42   :  { %465 = vperm.xlu1 %1897, %v391_v28   ;;  %v364_v28 = vld [vmem:[%s3124_s5 + $0xa8] sm:$0xff] }
  0x43   :  { %1762 = vmatmul.msk.f32.gmra.mxu0 %vm208_vm1, %v346_v6 }
  0x44   :  { %1800 = vmatmul.msk.f32.gmra.mxu1 %vm208_vm1, %v346_v6 }
  0x45   :  { %475 = vperm.xlu0 %1896, %v393_v12  }
  0x46   :  { %500 = vperm.xlu2 %1898, %v398_v18  }
  0x48   :  { %1822 = vmatmul.msk.f32.vlgmr.msra.gmra.mxu2 %vm208_vm1, %v368_v16 }
  0x49   :  { %1784 = vmatmul.msk.f32.vlgmr.msra.gmra.mxu3 %vm208_vm1, %v368_v16  ;;  %v362_v16 = vld [vmem:[%s3124_s5 + $0x98] sm:$0xff] }
  0x4a   :  { %560 = vperm.xlu1 %1897, %v410_v41  }
  0x4b   :  { %1763 = vmatmul.msk.f32.gmra.mxu0 %vm208_vm1, %v347_v11 }
  0x4c   :  { %1801 = vmatmul.msk.f32.gmra.mxu1 %vm208_vm1, %v347_v11 }
  0x4d   :  { %570 = vperm.xlu0 %1896, %v412_v17  }
  0x4e   :  { %470 = vperm.xlu2 %1898, %v392_v23  }
  0x50   :  { %1823 = vmatmul.msk.f32.gmra.mxu2 %vm208_vm1, %v369_v21 }
  0x51   :  { %1785 = vmatmul.msk.f32.gmra.mxu3 %vm208_vm1, %v369_v21 }
  0x52   :  { %550 = vperm.xlu1 %1897, %v408_v46   ;;  %v366_v46 = vld [vmem:[%s3124_s5 + $0xb8] sm:$0xff] }
  0x53   :  { %1764 = vmatmul.msk.f32.gmra.mxu0 %vm208_vm1, %v348_v15 }
  0x54   :  { %1802 = vmatmul.msk.f32.gmra.mxu1 %vm208_vm1, %v348_v15 }
  0x55   :  { %460 = vperm.xlu0 %1896, %v390_v22   ;;  %v363_v22 = vld [vmem:[%s3124_s5 + $0xa0] sm:$0xff] }
  0x56   :  { %565 = vperm.xlu2 %1898, %v411_v27  }
  0x58   :  { %1824 = vmatmul.msk.f32.gmra.mxu2 %vm208_vm1, %v370_v26 }
  0x59   :  { %1786 = vmatmul.msk.f32.gmra.mxu3 %vm208_vm1, %v370_v26 }
  0x5a   :  { %535 = vperm.xlu1 %1897, %v405_v52  }
  0x5b   :  { %1765 = vmatmul.msk.f32.gmra.mxu0 %vm208_vm1, %v349_v20 }
  0x5c   :  { %1803 = vmatmul.msk.f32.gmra.mxu1 %vm208_vm1, %v349_v20 }
  0x5d   :  { %555 = vperm.xlu0 %1896, %v409_v42  }
  0x5e   :  { %455 = vperm.xlu2 %1898, %v389_v31  }
  0x60   :  { %1825 = vmatmul.msk.f32.gmra.mxu2 %vm208_vm1, %v371_v30 }
  0x61   :  { %1787 = vmatmul.msk.f32.gmra.mxu3 %vm208_vm1, %v371_v30 }
  0x63   :  { %1766 = vmatmul.msk.f32.gmra.mxu0 %vm208_vm1, %v350_v25 }
  0x64   :  { %1804 = vmatmul.msk.f32.gmra.mxu1 %vm208_vm1, %v350_v25 }
  0x65   :  { %540 = vperm.xlu0 %1896, %v406_v47  }
  0x66   :  { %545 = vperm.xlu2 %1898, %v407_v3  }
  0x68   :  { %1826 = vmatmul.msk.f32.gmra.mxu2 %vm208_vm1, %v372_v33 }
  0x69   :  { %1788 = vmatmul.msk.f32.gmra.mxu3 %vm208_vm1, %v372_v33 }
  0x6b   :  { %1767 = vmatmul.msk.f32.gmra.mxu0 %vm208_vm1, %v351_v29 }
  0x6c   :  { %1805 = vmatmul.msk.f32.gmra.mxu1 %vm208_vm1, %v351_v29 }
  0x70   :  { %1827 = vmatmul.msk.f32.gmra.mxu2 %vm208_vm1, %v373_v35 }
  0x71   :  { %1789 = vmatmul.msk.f32.gmra.mxu3 %vm208_vm1, %v373_v35  ;;  %v365_v35 = vld [vmem:[%s3124_s5 + $0xb0] sm:$0xff] }
  0x73   :  { %1768 = vmatmul.msk.f32.gmra.mxu0 %vm208_vm1, %v352_v32 }
  0x74   :  { %1806 = vmatmul.msk.f32.gmra.mxu1 %vm208_vm1, %v352_v32 }
  0x78   :  { %1828 = vmatmul.msk.f32.gmra.mxu2 %vm208_vm1, %v374_v37  ;;  %v2544_v51 = vpop.permute.xlu2 %430 }
  0x79   :  { %1790 = vmatmul.msk.f32.gmra.mxu3 %vm208_vm1, %v374_v37  ;;  %v2588_v4 = vpop.permute.xlu1 %440 }
  0x7b   :  { %1769 = vmatmul.msk.f32.gmra.mxu0 %vm208_vm1, %v353_v34 }
  0x7c   :  { %1807 = vmatmul.msk.f32.gmra.mxu1 %vm208_vm1, %v353_v34 }
  0x7f   :  { %v2558_v56 = vpop.permute.xlu0 %450 }
  0x80   :  { %v2562_v57 = vpop.permute.xlu2 %530 }
  0x81   :  { %v436_v11 = vpop.permute.xlu1 %435 }
  0x83   :  { %1770 = vmatmul.msk.f32.gmra.mxu0 %vm208_vm1, %v354_v36 }
  0x84   :  { %1808 = vmatmul.msk.f32.gmra.mxu1 %vm208_vm1, %v354_v36 }
  0x88   :  { %v2507_v38 = vpop.f32.mrf.mxu0  ;;  %v2575_v62 = vpop.permute.xlu2 %420 }
  0x89   :  { %v2509_v39 = vpop.f32.mrf.mxu1 }
  0x8b   :  { %1771 = vmatmul.msk.f32.gmra.mxu0 %vm208_vm1, %v355_v40 }
  0x8c   :  { %1809 = vmatmul.msk.f32.gmra.mxu1 %vm208_vm1, %v355_v40  ;;  %v2618_v18 = vpop.permute.xlu1 %525 }
  0x8f   :  { %v2573_v61 = vpop.permute.xlu0 %445 }
  0x90   :  { %v2522_v43 = vpop.f32.mrf.mxu0  ;;  %v2594_v6 = vpop.permute.xlu2 %515 }
  0x91   :  { %v2524_v44 = vpop.f32.mrf.mxu1 }
  0x93   :  { %1772 = vmatmul.msk.f32.gmra.mxu0 %vm208_vm1, %v356_v45 }
  0x94   :  { %1810 = vmatmul.msk.f32.gmra.mxu1 %vm208_vm1, %v356_v45  ;;  %v2638_v29 = vpop.permute.xlu1 %415 }
  0x97   :  { %v2592_v5 = vpop.permute.xlu0 %425 }
  0x98   :  { %v2537_v48 = vpop.f32.mrf.mxu0  ;;  %v2608_v13 = vpop.permute.xlu2 %485 }
  0x99   :  { %3144 = vst [vmem:[#allocation5_spill] sm:$0xff] %v2537_v48  ;;  %v2539_v49 = vpop.f32.mrf.mxu1 }
  0x9a   :  { %3145 = vst [vmem:[#allocation6_spill] sm:$0xff] %v2539_v49 }
  0x9b   :  { %1773 = vmatmul.msk.f32.gmra.mxu0 %vm208_vm1, %v357_v50 }
  0x9c   :  { %1811 = vmatmul.msk.f32.gmra.mxu1 %vm208_vm1, %v357_v50  ;;  %v2653_v36 = vpop.permute.xlu1 %510 }
  0x9f   :  { %v2606_v12 = vpop.permute.xlu0 %520 }
  0xa0   :  { %v2551_v53 = vpop.f32.mrf.mxu0  ;;  %v2627_v24 = vpop.permute.xlu2 %500 }
  0xa1   :  { %3146 = vst [vmem:[#allocation7_spill] sm:$0xff] %v2551_v53  ;;  %v2553_v54 = vpop.f32.mrf.mxu1 }
  0xa2   :  { %3147 = vst [vmem:[#allocation8_spill] sm:$0xff] %v2553_v54 }
  0xa3   :  { %1774 = vmatmul.msk.f32.gmra.mxu0 %vm208_vm1, %v358_v55 }
  0xa4   :  { %1812 = vmatmul.msk.f32.gmra.mxu1 %vm208_vm1, %v358_v55  ;;  %v2671_v50 = vpop.permute.xlu1 %480 }
  0xa7   :  { %v2620_v19 = vpop.permute.xlu0 %490 }
  0xa8   :  { %v2564_v58 = vpop.f32.mrf.mxu0  ;;  %v2644_v31 = vpop.permute.xlu2 %470 }
  0xa9   :  { %v2566_v59 = vpop.f32.mrf.mxu1 }
  0xab   :  { %1775 = vmatmul.msk.f32.gmra.mxu0 %vm208_vm1, %v359_v60 }
  0xac   :  { %1813 = vmatmul.msk.f32.gmra.mxu1 %vm208_vm1, %v359_v60  ;;  %v2629_v25 = vpop.f32.mrf.mxu3 }
  0xaf   :  { %v2640_v30 = vpop.permute.xlu0 %505 }
  0xb0   :  { %v2577_v63 = vpop.f32.mrf.mxu0  ;;  %v2659_v40 = vpop.permute.xlu2 %565 }
  0xb1   :  { %v809_v0 = vpop.f32.mrf.mxu1 }
  0xb2   :  { %v2583_v2 = vadd.f32 %v809_v0, %v2575_v62 }
  0xb3   :  { %1776 = vmatmul.msk.f32.gmra.mxu0 %vm208_vm1, %v360_v1 }
  0xb4   :  { %1814 = vmatmul.msk.f32.gmra.mxu1 %vm208_vm1, %v360_v1  ;;  %v2646_v32 = vpop.f32.mrf.mxu3 }
  0xb5   :  { %3148 = vst [vmem:[#allocation9_spill] sm:$0xff] %v2646_v32 }
  0xb7   :  { %v2657_v37 = vpop.permute.xlu0 %475 }
  0xb8   :  { %v2596_v7 = vpop.f32.mrf.mxu0  ;;  %v2677_v0 = vpop.permute.xlu2 %455 }
  0xb9   :  { %v812_v8 = vpop.f32.mrf.mxu1 }
  0xba   :  { %v2602_v10 = vadd.f32 %v812_v8, %v2592_v5 }
  0xbb   :  { %1777 = vmatmul.msk.f32.gmra.mxu0 %vm208_vm1, %v361_v9 }
  0xbc   :  { %1815 = vmatmul.msk.f32.gmra.mxu1 %vm208_vm1, %v361_v9  ;;  %v2661_v41 = vpop.f32.mrf.mxu3 }
  0xbd   :  { %3149 = vst [vmem:[#allocation10_spill] sm:$0xff] %v2661_v41 }
  0xbf   :  { %v2674_v55 = vpop.permute.xlu0 %570 }
  0xc0   :  { %v695_v14 = vpop.f32.mrf.mxu0 }
  0xc1   :  { %v815_v15 = vpop.f32.mrf.mxu1 }
  0xc2   :  { %v2614_v17 = vadd.f32 %v815_v15, %v2544_v51  ;;  %v367_v15 = vld [vmem:[%s3124_s5 + $0xc0] sm:$0xff] }
  0xc3   :  { %1778 = vmatmul.msk.f32.gmra.mxu0 %vm208_vm1, %v362_v16 }
  0xc4   :  { %1816 = vmatmul.msk.f32.gmra.mxu1 %vm208_vm1, %v362_v16  ;;  %v2679_v1 = vpop.f32.mrf.mxu3 }
  0xc5   :  { %3150 = vst [vmem:[#allocation11_spill] sm:$0xff] %v2679_v1 }
  0xc8   :  { %v698_v20 = vpop.f32.mrf.mxu0 }
  0xc9   :  { %v818_v21 = vpop.f32.mrf.mxu1  ;;  %v699_v3 = vadd.f32 %v698_v20, %v436_v11  ;;  %v2697_v20 = vld [vmem:[%s3123_s4] ss:$0 sm:$0xff] }
  0xca   :  { %v2625_v23 = vadd.f32 %v818_v21, %v436_v11  ;;  %v696_v21 = vadd.f32 %v695_v14, %v2544_v51  ;;  %v693_v11 = vadd.f32 %v2596_v7, %v2592_v5  ;;  %v461_v51 = vpop.permute.xlu0 %460  ;;  %v687_v14 = vadd.f32 %v2564_v58, %v2638_v29 }
  0xcb   :  { %1779 = vmatmul.msk.f32.gmra.mxu0 %vm208_vm1, %v363_v22  ;;  %v94_v5 = vadd.f32 %v2697_v20, %v2507_v38 }
  0xcc   :  { %1817 = vmatmul.msk.f32.gmra.mxu1 %vm208_vm1, %v363_v22  ;;  %v2699_v22 = vpop.permute.xlu1 %495 }
  0xd0   :  { %v701_v26 = vpop.f32.mrf.mxu0 }
  0xd1   :  { %v2633_v27 = vpop.f32.mrf.mxu1  ;;  %v702_v60 = vadd.f32 %v701_v26, %v2588_v4  ;;  %v690_v26 = vadd.f32 %v2577_v63, %v2575_v62 }
  0xd3   :  { %1780 = vmatmul.msk.f32.gmra.mxu0 %vm208_vm1, %v364_v28 }
  0xd4   :  { %1818 = vmatmul.msk.f32.gmra.mxu1 %vm208_vm1, %v364_v28  ;;  %v466_v62 = vpop.permute.xlu1 %465 }
  0xd8   :  { %v704_v33 = vpop.f32.mrf.mxu0 }
  0xd9   :  { %v2648_v34 = vpop.f32.mrf.mxu1  ;;  %v705_v52 = vadd.f32 %v704_v33, %v2573_v61 }
  0xdb   :  { %1781 = vmatmul.msk.f32.gmra.mxu0 %vm208_vm1, %v365_v35 }
  0xdc   :  { %1819 = vmatmul.msk.f32.gmra.mxu1 %vm208_vm1, %v365_v35  ;;  %v2709_v35 = vpop.f32.mrf.mxu3 }
  0xe0   :  { %v707_v42 = vpop.f32.mrf.mxu0 }
  0xe1   :  { %v2663_v45 = vpop.f32.mrf.mxu1  ;;  %v708_v47 = vadd.f32 %v707_v42, %v2558_v56 }
  0xe3   :  { %1782 = vmatmul.msk.f32.gmra.mxu0 %vm208_vm1, %v366_v46  ;;  %914 = vmatpush.msrb.mxu2 %v708_v47 }
  0xe4   :  { %1820 = vmatmul.msk.f32.gmra.mxu1 %vm208_vm1, %v366_v46  ;;  %v764_v58 = vpop.f32.mrf.mxu3 }
  0xe5   :  { %915 = vmatpush.msrb.mxu2 %v705_v52 }
  0xe7   :  { %916 = vmatpush.msrb.mxu2 %v702_v60 }
  0xe8   :  { %v2681_v8 = vpop.f32.mrf.mxu0 }
  0xe9   :  { %v830_v9 = vpop.f32.mrf.mxu1  ;;  %917 = vmatpush.msrb.mxu2 %v699_v3 }
  0xea   :  { %v2687_v16 = vadd.f32 %v830_v9, %v2677_v0 }
  0xeb   :  { %1783 = vmatmul.msk.f32.gmra.mxu0 %vm208_vm1, %v367_v15  ;;  %918 = vmatpush.msrb.mxu2 %v696_v21  ;;  %v2720_v21 = vpop.f32.mrf.mxu2 }
  0xec   :  { %1821 = vmatmul.msk.f32.gmra.mxu1 %vm208_vm1, %v367_v15  ;;  %v767_v3 = vpop.f32.mrf.mxu3 }
  0xed   :  { %919 = vmatpush.msrb.mxu2 %v693_v11 }
  0xef   :  { %920 = vmatpush.msrb.mxu2 %v690_v26 }
  0xf0   :  { %v713_v28 = vpop.f32.mrf.mxu0 }
  0xf1   :  { %v833_v33 = vpop.f32.mrf.mxu1  ;;  %921 = vmatpush.msrb.mxu2 %v687_v14 }
  0xf2   :  { %v2707_v7 = vadd.f32 %v833_v33, %v461_v51  ;;  %1829 = vmatmul.msk.f32.vlgmr.msrb.gmra.mxu2 %vm902_vm2, %v94_v5 }
  0xf3   :  { %v2722_v14 = vpop.f32.mrf.mxu2 }
  0xf4   :  { %v770_v11 = vpop.f32.mrf.mxu3  ;;  %3151 = vst [vmem:[#allocation12_spill] sm:$0xff] %v2722_v14 }
  0xf8   :  { %v716_v63 = vpop.f32.mrf.mxu0 }
  0xf9   :  { %v836_v42 = vpop.f32.mrf.mxu1 }
  0xfa   :  { %v2712_v46 = vadd.f32 %v836_v42, %v466_v62 }
  0xfb   :  { %v2726_v1 = vpop.f32.mrf.mxu2 }
  0xfc   :  { %v773_v42 = vpop.f32.mrf.mxu3  ;;  %3152 = vst [vmem:[#allocation13_spill] sm:$0xff] %v2726_v1 }
 0x100   :  { %v719_v47 = vpop.f32.mrf.mxu0 }
 0x101   :  { %v839_v52 = vpop.f32.mrf.mxu1  ;;  %v720_v1 = vadd.f32 %v719_v47, %v2644_v31 }
 0x102   :  { %v2715_v60 = vadd.f32 %v839_v52, %v2644_v31 }
 0x103   :  { %v2734_v53 = vpop.f32.mrf.mxu2 }
 0x104   :  { %v776_v48 = vpop.f32.mrf.mxu3  ;;  %3153 = vst [vmem:[#allocation14_spill] sm:$0xff] %v2734_v53 }
 0x108   :  { %v722_v38 = vpop.f32.mrf.mxu0 }
 0x109   :  { %v842_v9 = vpop.f32.mrf.mxu1  ;;  %v723_v14 = vadd.f32 %v722_v38, %v2657_v37  ;;  %v2763_v38 = vpop.permute.xlu2 %545 }
 0x10a   :  { %v2718_v15 = vadd.f32 %v842_v9, %v2657_v37  ;;  %v711_v37 = vadd.f32 %v2681_v8, %v2677_v0 }
 0x10b   :  { %v2753_v47 = vpop.f32.mrf.mxu2 }
 0x10c   :  { %3154 = vst [vmem:[#allocation15_spill] sm:$0xff] %v2753_v47 }
 0x110   :  { %v725_v26 = vpop.f32.mrf.mxu0 }
 0x111   :  { %v2724_v33 = vpop.f32.mrf.mxu1  ;;  %v726_v49 = vadd.f32 %v725_v26, %v2671_v50  ;;  %v714_v26 = vadd.f32 %v713_v28, %v461_v51  ;;  %v777_v51 = vadd.f32 %v776_v48, %v2659_v40  ;;  %v765_v48 = vadd.f32 %v764_v58, %v2763_v38 }
 0x118   :  { %v728_v5 = vpop.f32.mrf.mxu0 }
 0x119   :  { %v2729_v54 = vpop.f32.mrf.mxu1  ;;  %v729_v9 = vadd.f32 %v728_v5, %v2608_v13 }
 0x120   :  { %v731_v52 = vpop.f32.mrf.mxu0 }
 0x121   :  { %v732_v41 = vadd.f32 %v731_v52, %v2620_v19  ;;  %v717_v52 = vadd.f32 %v716_v63, %v466_v62  ;;  %v851_v5 = vpop.f32.mrf.mxu1  ;;  %v2750_v62 = vpop.permute.xlu0 %555 }
 0x123   :  { %937 = vmatpush.msrb.mxu3 %v732_v41  ;;  %v2742_v41 = vld [vmem:[%s3123_s4 + $0x1] ss:$0 sm:$0xff] }
 0x124   :  { %v127_v31 = vadd.f32 %v2742_v41, %v2509_v39  ;;  %v771_v39 = vadd.f32 %v770_v11, %v2750_v62 }
 0x125   :  { %938 = vmatpush.msrb.mxu3 %v729_v9  ;;  %v2744_v9 = vpop.permute.xlu1 %560 }
 0x126   :  { %v774_v28 = vadd.f32 %v773_v42, %v2744_v9  ;;  %v2769_v42 = vpop.f32.mrf.mxu2 }
 0x127   :  { %939 = vmatpush.msrb.mxu3 %v726_v49  ;;  %v779_v49 = vpop.f32.mrf.mxu3 }
 0x128   :  { %v2736_v32 = vpop.f32.mrf.mxu0  ;;  %v780_v63 = vadd.f32 %v779_v49, %v2674_v55 }
 0x129   :  { %940 = vmatpush.msrb.mxu3 %v723_v14  ;;  %v2758_v0 = vpop.f32.mrf.mxu1 }
 0x12a   :  { %3155 = vst [vmem:[#allocation16_spill] sm:$0xff] %v2758_v0 }
 0x12b   :  { %941 = vmatpush.msrb.mxu3 %v720_v1 }
 0x12d   :  { %942 = vmatpush.msrb.mxu3 %v717_v52  ;;  %v2761_v8 = vpop.permute.xlu1 %550 }
 0x12e   :  { %v768_v52 = vadd.f32 %v767_v3, %v2761_v8 }
 0x12f   :  { %943 = vmatpush.msrb.mxu3 %v714_v26  ;;  %v2766_v26 = vpop.permute.xlu0 %540 }
 0x130   :  { %v737_v1 = vpop.f32.mrf.mxu0  ;;  %3156 = vst [vmem:[#allocation17_spill] sm:$0xff] %v2766_v26  ;;  %v762_v49 = vadd.f32 %v2709_v35, %v2766_v26 }
 0x131   :  { %944 = vmatpush.msrb.mxu3 %v711_v37  ;;  %v2773_v11 = vpop.f32.mrf.mxu1 }
 0x132   :  { %1830 = vmatmul.msk.f32.vlgmr.msrb.gmra.mxu3 %vm902_vm2, %v127_v31  ;;  %3157 = vst [vmem:[#allocation18_spill] sm:$0xff] %v2773_v11  ;;  %v2775_v31 = vpop.f32.mrf.mxu2 }
 0x133   :  { %983 = vmatpush.msra.mxu3 %v780_v63 }
 0x135   :  { %984 = vmatpush.msra.mxu3 %v777_v51 }
 0x137   :  { %985 = vmatpush.msra.mxu3 %v774_v28 }
 0x138   :  { %v740_v14 = vpop.f32.mrf.mxu0 }
 0x139   :  { %986 = vmatpush.msra.mxu3 %v771_v39  ;;  %v2777_v3 = vpop.f32.mrf.mxu1  ;;  %v741_v26 = vadd.f32 %v740_v14, %v2640_v30 }
 0x13a   :  { %3158 = vst [vmem:[#allocation19_spill] sm:$0xff] %v2777_v3  ;;  %v2779_v51 = vpop.f32.mrf.mxu2  ;;  %v2793_v3 = vld [vmem:[%s3123_s4 + $0x3] ss:$0 sm:$0xff] }
 0x13b   :  { %987 = vmatpush.msra.mxu3 %v768_v52 }
 0x13d   :  { %988 = vmatpush.msra.mxu3 %v765_v48 }
 0x13f   :  { %989 = vmatpush.msra.mxu3 %v762_v49 }
 0x140   :  { %v743_v37 = vpop.f32.mrf.mxu0 }
 0x141   :  { %v2781_v58 = vpop.f32.mrf.mxu1 }
 0x142   :  { %3159 = vst [vmem:[#allocation20_spill] sm:$0xff] %v2781_v58  ;;  %v2783_v52 = vpop.f32.mrf.mxu2  ;;  %v2795_v58 = vpop.permute.xlu1 %535 }
 0x148   :  { %v746_v63 = vpop.f32.mrf.mxu0 }
 0x149   :  { %v2785_v53 = vpop.f32.mrf.mxu1  ;;  %v747_v47 = vadd.f32 %v746_v63, %v2594_v6  ;;  %v828_v63 = vadd.f32 %v2663_v45, %v2558_v56  ;;  %v891_v45 = vadd.f32 %v2779_v51, %v2750_v62  ;;  %v3168_v62 = vld [vmem:[#allocation6_spill] sm:$0xff] }
 0x14a   :  { %3160 = vst [vmem:[#allocation21_spill] sm:$0xff] %v2785_v53  ;;  %v896_v0 = vpop.f32.mrf.mxu2 }
 0x150   :  { %v749_v28 = vpop.f32.mrf.mxu0 }
 0x151   :  { %v750_v11 = vadd.f32 %v749_v28, %v2606_v12  ;;  %v2798_v53 = vpop.f32.mrf.mxu1  ;;  %v193_v28 = vadd.f32 %v2793_v3, %v2629_v25 }
 0x152   :  { %v899_v25 = vpop.f32.mrf.mxu2 }
 0x158   :  { %v752_v39 = vpop.f32.mrf.mxu0 }
 0x159   :  { %v753_v49 = vadd.f32 %v752_v39, %v2618_v18  ;;  %v744_v39 = vadd.f32 %v743_v37, %v2653_v36  ;;  %v849_v37 = vadd.f32 %v2729_v54, %v2608_v13  ;;  %v872_v54 = vpop.f32.mrf.mxu1  ;;  %v825_v13 = vadd.f32 %v2648_v34, %v2573_v61 }
 0x15a   :  { %v130_v61 = vadd.f32 %v2742_v41, %v2524_v44  ;;  %v897_v34 = vadd.f32 %v896_v0, %v2659_v40  ;;  %v894_v44 = vadd.f32 %v2783_v52, %v2744_v9  ;;  %v3167_v41 = vld [vmem:[#allocation19_spill] sm:$0xff] }
 0x15b   :  { %v861_v9 = vadd.f32 %v3167_v41, %v2640_v30 }
 0x160   :  { %v755_v35 = vpop.f32.mrf.mxu0 }
 0x161   :  { %v756_v48 = vadd.f32 %v755_v35, %v2562_v57 }
 0x163   :  { %960 = vmatpush.msra.mxu2 %v756_v48 }
 0x165   :  { %961 = vmatpush.msra.mxu2 %v753_v49  ;;  %v852_v49 = vadd.f32 %v851_v5, %v2620_v19  ;;  %v846_v19 = vadd.f32 %v2724_v33, %v2671_v50  ;;  %v735_v5 = vadd.f32 %v2736_v32, %v2699_v22  ;;  %v822_v32 = vadd.f32 %v2633_v27, %v2588_v4  ;;  %v875_v27 = vpop.f32.mrf.mxu1 }
 0x166   :  { %v900_v4 = vadd.f32 %v899_v25, %v2674_v55  ;;  %v876_v40 = vadd.f32 %v875_v27, %v2562_v57  ;;  %v3162_v55 = vld [vmem:[#allocation15_spill] sm:$0xff] }
 0x167   :  { %962 = vmatpush.msra.mxu2 %v750_v11  ;;  %v2809_v11 = vld [vmem:[%s3123_s4 + $0x2] ss:$0 sm:$0xff] }
 0x168   :  { %v758_v35 = vpop.f32.mrf.mxu0  ;;  %v160_v14 = vadd.f32 %v2809_v11, %v2720_v21  ;;  %v3166_v21 = vld [vmem:[#allocation7_spill] sm:$0xff] }
 0x169   :  { %v759_v48 = vadd.f32 %v758_v35, %v2795_v58  ;;  %963 = vmatpush.msra.mxu2 %v747_v47  ;;  %v738_v47 = vadd.f32 %v737_v1, %v2627_v24 }
 0x16b   :  { %964 = vmatpush.msra.mxu2 %v744_v39  ;;  %990 = vmatpush.msra.mxu3 %v759_v48 }
 0x16c   :  { %1832 = vmatmul.msk.f32.vlgmr.msra.gmra.mxu3 %vm902_vm2, %v193_v28 }
 0x16d   :  { %1029 = vmatpush.msrb.mxu3 %v852_v49  ;;  %965 = vmatpush.msra.mxu2 %v741_v26  ;;  %v878_v57 = vpop.f32.mrf.mxu1  ;;  %v3171_v26 = vld [vmem:[#allocation12_spill] sm:$0xff] }
 0x16e   :  { %v163_v30 = vadd.f32 %v2809_v11, %v3171_v26  ;;  %v1233_v26 = vld [vmem:[%s3128_s9 + $0x28] sm:$0xff] }
 0x16f   :  { %1030 = vmatpush.msrb.mxu3 %v849_v37  ;;  %966 = vmatpush.msra.mxu2 %v738_v47 }
 0x171   :  { %1031 = vmatpush.msrb.mxu3 %v846_v19  ;;  %967 = vmatpush.msra.mxu2 %v735_v5 }
 0x172   :  { %1831 = vmatmul.msk.f32.vlgmr.msra.gmra.mxu2 %vm902_vm2, %v160_v14 }
 0x173   :  { %1006 = vmatpush.msrb.mxu2 %v828_v63  ;;  %1032 = vmatpush.msrb.mxu3 %v2718_v15  ;;  %v3165_v15 = vld [vmem:[#allocation9_spill] sm:$0xff] }
 0x175   :  { %1007 = vmatpush.msrb.mxu2 %v825_v13  ;;  %1033 = vmatpush.msrb.mxu3 %v2715_v60  ;;  %v2830_v50 = vpop.f32.mrf.mxu2  ;;  %v879_v60 = vadd.f32 %v878_v57, %v2795_v58 }
 0x176   :  { %v1088_v56 = vsel %vm1087_vm3, %v2830_v50, -inf }
 0x177   :  { %1008 = vmatpush.msrb.mxu2 %v822_v32  ;;  %1034 = vmatpush.msrb.mxu3 %v2712_v46 }
 0x178   :  { %1089 = vmax.xlane.f32.xlu2 %v1088_v56 }
 0x179   :  { %1009 = vmatpush.msrb.mxu2 %v2625_v23  ;;  %1035 = vmatpush.msrb.mxu3 %v2707_v7  ;;  %v807_v23 = vadd.f32 %v2566_v59, %v2638_v29  ;;  %v888_v59 = vadd.f32 %v2775_v31, %v2761_v8  ;;  %v3161_v29 = vld [vmem:[#allocation17_spill] sm:$0xff]  ;;  %v3170_v8 = vld [vmem:[#allocation16_spill] sm:$0xff] }
 0x17b   :  { %1010 = vmatpush.msrb.mxu2 %v2614_v17  ;;  %1036 = vmatpush.msrb.mxu3 %v2687_v16  ;;  %v97_v17 = vadd.f32 %v2697_v20, %v2522_v43  ;;  %v870_v43 = vadd.f32 %v2798_v53, %v2606_v12  ;;  %v882_v16 = vadd.f32 %v3162_v55, %v3161_v29  ;;  %v3163_v20 = vld [vmem:[#allocation21_spill] sm:$0xff]  ;;  %v1901_v53 = vld [vmem:[%s3127_s8] ss:$0 sm:$0xff]  ;;  %v3164_v12 = vld [vmem:[#allocation20_spill] sm:$0xff] }
 0x17c   :  { %1834 = vmatmul.msk.f32.vlgmr.msrb.gmra.mxu3 %vm902_vm2, %v130_v61  ;;  %v867_v7 = vadd.f32 %v3163_v20, %v2594_v6  ;;  %v864_v46 = vadd.f32 %v3164_v12, %v2653_v36  ;;  %v196_v6 = vadd.f32 %v2793_v3, %v3165_v15  ;;  %v236_v33 = vadd.f32 %v1901_v53, %v3166_v21  ;;  %v3169_v36 = vld [vmem:[#allocation18_spill] sm:$0xff] }
 0x17d   :  { %1075 = vmatpush.msra.mxu3 %v900_v4  ;;  %1011 = vmatpush.msrb.mxu2 %v2602_v10  ;;  %v873_v10 = vadd.f32 %v872_v54, %v2618_v18  ;;  %v2870_v18 = vld [vmem:[%s3127_s8 + $0x1] ss:$0 sm:$0xff]  ;;  %v858_v0 = vadd.f32 %v3169_v36, %v2627_v24 }
 0x17e   :  { %v268_v1 = vadd.f32 %v2870_v18, %v3168_v62 }
 0x17f   :  { %1076 = vmatpush.msra.mxu3 %v897_v34  ;;  %1012 = vmatpush.msrb.mxu2 %v2583_v2  ;;  %v885_v2 = vadd.f32 %v2769_v42, %v2763_v38  ;;  %v855_v38 = vadd.f32 %v3170_v8, %v2699_v22  ;;  %v3172_v42 = vld [vmem:[#allocation5_spill] sm:$0xff]  ;;  %v1235_v8 = vld [vmem:[%s3128_s9 + $0x38] sm:$0xff] }
 0x180   :  { %v233_v31 = vadd.f32 %v1901_v53, %v3172_v42  ;;  %v1231_v42 = vld [vmem:[%s3128_s9 + $0x18] sm:$0xff] }
 0x181   :  { %1077 = vmatpush.msra.mxu3 %v894_v44  ;;  %1013 = vmatpush.msrb.mxu2 %v807_v23 }
 0x182   :  { %1833 = vmatmul.msk.f32.vlgmr.msrb.gmra.mxu2 %vm902_vm2, %v97_v17 }
 0x183   :  { %1052 = vmatpush.msra.mxu2 %v876_v40  ;;  %1078 = vmatpush.msra.mxu3 %v891_v45 }
 0x185   :  { %1053 = vmatpush.msra.mxu2 %v873_v10  ;;  %1079 = vmatpush.msra.mxu3 %v888_v59 }
 0x187   :  { %1054 = vmatpush.msra.mxu2 %v870_v43  ;;  %1080 = vmatpush.msra.mxu3 %v885_v2 }
 0x189   :  { %1055 = vmatpush.msra.mxu2 %v867_v7  ;;  %1081 = vmatpush.msra.mxu3 %v882_v16 }
 0x18b   :  { %1056 = vmatpush.msra.mxu2 %v864_v46  ;;  %1082 = vmatpush.msra.mxu3 %v879_v60 }
 0x18c   :  { %1836 = vmatmul.msk.f32.vlgmr.msra.gmra.mxu3 %vm902_vm2, %v196_v6 }
 0x18d   :  { %1223 = vmatpush.msrb.mxu3 %v236_v33  ;;  %1057 = vmatpush.msra.mxu2 %v861_v9 }
 0x18f   :  { %1285 = vmatpush.msra.mxu3 %v268_v1  ;;  %1058 = vmatpush.msra.mxu2 %v858_v0 }
 0x191   :  { %1059 = vmatpush.msra.mxu2 %v855_v38  ;;  %v1234_v38 = vld [vmem:[%s3128_s9 + $0x30] sm:$0xff] }
 0x192   :  { %1835 = vmatmul.msk.f32.vlgmr.msra.gmra.mxu2 %vm902_vm2, %v163_v30  ;;  %v1232_v30 = vld [vmem:[%s3128_s9 + $0x20] sm:$0xff] }
 0x193   :  { %1200 = vmatpush.msrb.mxu2 %v233_v31  ;;  %v1230_v31 = vld [vmem:[%s3128_s9 + $0x10] sm:$0xff] }
 0x195   :  { %1250 = vmatpush.msra.mxu2 %v1235_v8  ;;  %v1870_v8 = vld [vmem:[%s3128_s9 + $0xd8] sm:$0xff] }
 0x197   :  { %1251 = vmatpush.msra.mxu2 %v1234_v38 }
 0x199   :  { %1252 = vmatpush.msra.mxu2 %v1233_v26  ;;  %v1869_v26 = vld [vmem:[%s3128_s9 + $0xd0] sm:$0xff] }
 0x19b   :  { %1253 = vmatpush.msra.mxu2 %v1232_v30  ;;  %v1868_v30 = vld [vmem:[%s3128_s9 + $0xc8] sm:$0xff] }
 0x19d   :  { %1254 = vmatpush.msra.mxu2 %v1231_v42  ;;  %v1867_v42 = vld [vmem:[%s3128_s9 + $0xc0] sm:$0xff] }
 0x19f   :  { %1255 = vmatpush.msra.mxu2 %v1230_v31 }
 0x1b5   :  { %v946_v3 = vpop.f32.mrf.mxu3 }
 0x1b6   :  { %v1091_v51 = vsel %vm1087_vm3, %v946_v3, -inf }
 0x1b7   :  { %1092 = vmax.xlane.f32.xlu1 %v1091_v51  ;;  %v1228_v51 = vld [vmem:[%s3128_s9] sm:$0xff] }
 0x1eb   :  { %v1090_v52 = vpop.xlane.xlu2 %1089 }
 0x1ec   :  { %v1112_v35 = vsub.f32 %v2830_v50, %v1090_v52 }
 0x1ee   :  { %v1120_v28 = vmul.f32 1.442695, %v1112_v35  ;;  %v3173_v35 = vld [vmem:[#allocation8_spill] sm:$0xff] }
 0x1ef   :  { %v992_v24 = vpop.f32.mrf.mxu3 }
 0x1f0   :  { %v1097_v58 = vsel %vm1087_vm3, %v992_v24, -inf  ;;  %1913 = vpow2.f32 %v1120_v28 }
 0x1f1   :  { %1098 = vmax.xlane.f32.xlu1 %v1097_v58 }
 0x1f5   :  { %v969_v22 = vpop.f32.mrf.mxu2 }
 0x1f6   :  { %v1094_v37 = vsel %vm1087_vm3, %v969_v22, -inf  ;;  %v1914_v47 = vpop.eup %1913 }
 0x1f7   :  { %v1136_v25 = vsel %vm1087_vm3, %v1914_v47, 0.0 }
 0x1ff   :  { %v1038_v39 = vpop.f32.mrf.mxu3 }
 0x200   :  { %v1103_v48 = vsel %vm1087_vm3, %v1038_v39, -inf }
 0x201   :  { %1104 = vmax.xlane.f32.xlu2 %v1103_v48 }
 0x205   :  { %v1015_v49 = vpop.f32.mrf.mxu2 }
 0x206   :  { %v1100_v11 = vsel %vm1087_vm3, %v1015_v49, -inf }
 0x207   :  { %1101 = vmax.xlane.f32.xlu0 %v1100_v11 }
 0x209   :  { %1095 = vmax.xlane.f32.xlu2 %v1094_v37  ;;  %v3174_v37 = vld [vmem:[#allocation13_spill] sm:$0xff] }
 0x20f   :  { %v1084_v14 = vpop.f32.mrf.mxu3 }
 0x210   :  { %v1109_v63 = vsel %vm1087_vm3, %v1084_v14, -inf }
 0x211   :  { %1137 = vadd.xlane.f32.xlu2 %v1136_v25 }
 0x215   :  { %v1061_v19 = vpop.f32.mrf.mxu2 }
 0x216   :  { %v1106_v5 = vsel %vm1087_vm3, %v1061_v19, -inf }
 0x217   :  { %1107 = vmax.xlane.f32.xlu0 %v1106_v5 }
 0x21f   :  { %1110 = vmax.xlane.f32.xlu0 %v1109_v63 }
 0x22a   :  { %v1093_v54 = vpop.xlane.xlu1 %1092 }
 0x22b   :  { %v1113_v13 = vsub.f32 %v946_v3, %v1093_v54  ;;  %v1229_v3 = vld [vmem:[%s3128_s9 + $0x8] sm:$0xff]  ;;  %v1850_v54 = vld [vmem:[%s3128_s9 + $0x78] sm:$0xff] }
 0x22c   :  { %1256 = vmatpush.msra.mxu2 %v1229_v3 }
 0x22d   :  { %v1122_v32 = vmul.f32 1.442695, %v1113_v13  ;;  %v1849_v13 = vld [vmem:[%s3128_s9 + $0x70] sm:$0xff] }
 0x22e   :  { %1257 = vmatpush.msra.mxu2 %v1228_v51 }
 0x22f   :  { %1915 = vpow2.f32 %v1122_v32 }
 0x235   :  { %v2903_v50 = vpop.eup %1915 }
 0x236   :  { %v1139_v56 = vsel %vm1087_vm3, %v2903_v50, 0.0 }
 0x237   :  { %1140 = vadd.xlane.f32.xlu2 %v1139_v56 }
 0x264   :  { %v1099_v61 = vpop.xlane.xlu1 %1098 }
 0x265   :  { %v1115_v34 = vsub.f32 %v992_v24, %v1099_v61  ;;  %v1906_v61 = vld [vmem:[%s3127_s8 + $0x3] ss:$0 sm:$0xff] }
 0x267   :  { %v1126_v44 = vmul.f32 1.442695, %v1115_v34  ;;  %v3176_v34 = vld [vmem:[#allocation10_spill] sm:$0xff] }
 0x274   :  { %v1105_v4 = vpop.xlane.xlu2 %1104 }
 0x275   :  { %v1117_v27 = vsub.f32 %v1038_v39, %v1105_v4  ;;  %v271_v39 = vadd.f32 %v2870_v18, %v3173_v35  ;;  %v1847_v4 = vld [vmem:[%s3128_s9 + $0x60] sm:$0xff] }
 0x277   :  { %v1130_v23 = vmul.f32 1.442695, %v1117_v27 }
 0x279   :  { %1917 = vpow2.f32 %v1130_v23  ;;  %v338_v23 = vadd.f32 %v1906_v61, %v3176_v34  ;;  %v1984_v34 = vmov 32.0  }
 0x27a   :  { %v1102_v17 = vpop.xlane.xlu0 %1101  ;;  %1919 = vpow2.f32 %v1126_v44 }
 0x27b   :  { %v1116_v45 = vsub.f32 %v1015_v49, %v1102_v17  ;;  %v1905_v49 = vld [vmem:[%s3127_s8 + $0x2] ss:$0 sm:$0xff] }
 0x27c   :  { %v1096_v40 = vpop.xlane.xlu2 %1095 }
 0x27d   :  { %v1128_v59 = vmul.f32 1.442695, %v1116_v45  ;;  %v1114_v10 = vsub.f32 %v969_v22, %v1096_v40  ;;  %v3177_v40 = vld [vmem:[#allocation11_spill] sm:$0xff] }
 0x27f   :  { %v2907_v2 = vpop.eup %1917  ;;  %1921 = vpow2.f32 %v1128_v59  ;;  %v1124_v43 = vmul.f32 1.442695, %v1114_v10  ;;  %v341_v59 = vadd.f32 %v1906_v61, %v3177_v40 }
 0x280   :  { %v1151_v57 = vsel %vm1087_vm3, %v2907_v2, 0.0  ;;  %v2911_v29 = vpop.eup %1919 }
 0x281   :  { %1152 = vadd.xlane.f32.xlu0 %v1151_v57  ;;  %1923 = vpow2.f32 %v1124_v43  ;;  %v1145_v7 = vsel %vm1087_vm3, %v2911_v29, 0.0 }
 0x284   :  { %v1138_v55 = vpop.xlane.xlu2 %1137 }
 0x285   :  { %v1922_v16 = vpop.eup %1921  ;;  %1925 = vrcp.f32 %v1138_v55 }
 0x286   :  { %v1148_v20 = vsel %vm1087_vm3, %v1922_v16, 0.0 }
 0x287   :  { %1149 = vadd.xlane.f32.xlu1 %v1148_v20  ;;  %v2916_v53 = vpop.eup %1923  ;;  %v1845_v20 = vld [vmem:[%s3128_s9 + $0x50] sm:$0xff] }
 0x288   :  { %v1142_v21 = vsel %vm1087_vm3, %v2916_v53, 0.0 }
 0x289   :  { %1146 = vadd.xlane.f32.xlu0 %v1145_v7  ;;  %v1843_v7 = vld [vmem:[%s3128_s9 + $0x40] sm:$0xff] }
 0x28a   :  { %v1108_v12 = vpop.xlane.xlu0 %1107 }
 0x28b   :  { %v1926_v46 = vpop.eup %1925  ;;  %v1118_v60 = vsub.f32 %v1061_v19, %v1108_v12  ;;  %v1861_v12 = vld [vmem:[%s3128_s9 + $0xb0] sm:$0xff] }
 0x28c   :  { %v1168_v15 = vmul.f32 %v1926_v46, %v1914_v47  ;;  %v303_v47 = vadd.f32 %v1905_v49, %v3174_v37  ;;  %v1860_v46 = vld [vmem:[%s3128_s9 + $0xa8] sm:$0xff] }
 0x28d   :  { %v1132_v6 = vmul.f32 1.442695, %v1118_v60  ;;  %v1859_v60 = vld [vmem:[%s3128_s9 + $0xa0] sm:$0xff] }
 0x28e   :  { %1837 = vmatmul.msk.f32.vlgmr.msrb.gmra.mxu2 %vm1087_vm3, %v1168_v15  ;;  %v1858_v15 = vld [vmem:[%s3128_s9 + $0x98] sm:$0xff] }
 0x28f   :  { %1927 = vpow2.f32 %v1132_v6  ;;  %1143 = vadd.xlane.f32.xlu1 %v1142_v21  ;;  %1336 = vmatpush.msrb.mxu2 %v1850_v54  ;;  %v1857_v6 = vld [vmem:[%s3128_s9 + $0x90] sm:$0xff]  ;;  %v1856_v21 = vld [vmem:[%s3128_s9 + $0x88] sm:$0xff] }
 0x291   :  { %1337 = vmatpush.msrb.mxu2 %v1849_v13 }
 0x292   :  { %v1111_v33 = vpop.xlane.xlu0 %1110 }
 0x293   :  { %v1119_v41 = vsub.f32 %v1084_v14, %v1111_v33  ;;  %v3175_v14 = vld [vmem:[#allocation14_spill] sm:$0xff]  ;;  %v1855_v33 = vld [vmem:[%s3128_s9 + $0x80] sm:$0xff] }
 0x294   :  { %v306_v63 = vadd.f32 %v1905_v49, %v3175_v14 }
 0x295   :  { %v2921_v9 = vpop.eup %1927  ;;  %v1134_v62 = vmul.f32 1.442695, %v1119_v41 }
 0x296   :  { %v1154_v1 = vsel %vm1087_vm3, %v2921_v9, 0.0 }
 0x297   :  { %1929 = vpow2.f32 %v1134_v62  ;;  %1155 = vadd.xlane.f32.xlu2 %v1154_v1  ;;  %v1873_v1 = vld [vmem:[%s3128_s9 + $0xf0] sm:$0xff] }
 0x29d   :  { %v2925_v36 = vpop.eup %1929 }
 0x29e   :  { %v1157_v0 = vsel %vm1087_vm3, %v2925_v36, 0.0 }
 0x29f   :  { %1158 = vadd.xlane.f32.xlu1 %v1157_v0  ;;  %v1871_v0 = vld [vmem:[%s3128_s9 + $0xe0] sm:$0xff] }
 0x2aa   :  { %v1141_v58 = vpop.xlane.xlu2 %1140 }
 0x2f4   :  { %v1153_v48 = vpop.xlane.xlu0 %1152 }
 0x2fa   :  { %v1150_v24 = vpop.xlane.xlu1 %1149 }
 0x2fb   :  { %1931 = vrcp.f32 %v1150_v24 }
 0x2fc   :  { %1933 = vrcp.f32 %v1141_v58  ;;  %v1147_v44 = vpop.xlane.xlu0 %1146 }
 0x2fd   :  { %1935 = vrcp.f32 %v1153_v48  ;;  %v1907_v48 = vld [vmem:[%s3129_s10] ss:$0 sm:$0xff] }
 0x301   :  { %v1932_v52 = vpop.eup %1931 }
 0x302   :  { %v1172_v22 = vmul.f32 %v1932_v52, %v1922_v16  ;;  %v1934_v28 = vpop.eup %1933  ;;  %v1144_v25 = vpop.xlane.xlu1 %1143  ;;  %v1846_v16 = vld [vmem:[%s3128_s9 + $0x58] sm:$0xff] }
 0x303   :  { %v1169_v11 = vmul.f32 %v1934_v28, %v2903_v50  ;;  %v1936_v19 = vpop.eup %1935  ;;  %1937 = vrcp.f32 %v1144_v25  ;;  %v1848_v50 = vld [vmem:[%s3128_s9 + $0x68] sm:$0xff]  ;;  %v1955_v28 = vld [vmem:[%s3142_s27] sm:$0xff] }
 0x304   :  { %1838 = vmatmul.msk.f32.vlgmr.msrb.gmra.mxu3 %vm1087_vm3, %v1172_v22  ;;  %v1173_v5 = vmul.f32 %v1936_v19, %v2907_v2  ;;  %1338 = vmatpush.msrb.mxu2 %v1848_v50  ;;  %v1180_v49 = vadd.f32 %v1955_v28, %v1907_v48  ;;  %v1956_v25 = vld [vmem:[%s3142_s27 + $0x8] sm:$0xff] }
 0x305   :  { %1308 = vmatpush.msrb.mxu3 %v271_v39  ;;  %v1181_v19 = vadd.f32 %v1956_v25, %v1907_v48 }
 0x306   :  { %1339 = vmatpush.msrb.mxu2 %v1847_v4 }
 0x308   :  { %1340 = vmatpush.msrb.mxu2 %v1846_v16 }
 0x309   :  { %v1938_v56 = vpop.eup %1937 }
 0x30a   :  { %v1156_v32 = vpop.xlane.xlu2 %1155  ;;  %v1170_v27 = vmul.f32 %v1938_v56, %v2916_v53  ;;  %1341 = vmatpush.msrb.mxu2 %v1845_v20  ;;  %v1862_v53 = vld [vmem:[%s3128_s9 + $0xb8] sm:$0xff] }
 0x30b   :  { %1939 = vrcp.f32 %v1156_v32 }
 0x30c   :  { %1841 = vmatmul.msk.f32.vlgmr.msra.gmra.mxu3 %vm1087_vm3, %v1169_v11  ;;  %1941 = vrcp.f32 %v1147_v44 }
 0x30d   :  { %1371 = vmatpush.msra.mxu3 %v303_v47 }
 0x311   :  { %v1202_v18 = vpop.f32.mrf.mxu2  ;;  %v1940_v17 = vpop.eup %1939 }
 0x312   :  { %1839 = vmatmul.msk.f32.vlgmr.msra.gmra.mxu2 %vm902_vm2, %v1202_v18  ;;  %v1174_v45 = vmul.f32 %v1940_v17, %v2921_v9  ;;  %v1159_v10 = vpop.xlane.xlu1 %1158  ;;  %v1942_v2 = vpop.eup %1941  ;;  %v1874_v9 = vld [vmem:[%s3128_s9 + $0xf8] sm:$0xff] }
 0x313   :  { %1943 = vrcp.f32 %v1159_v10  ;;  %v1171_v43 = vmul.f32 %v1942_v2, %v2911_v29  ;;  %v1844_v29 = vld [vmem:[%s3128_s9 + $0x48] sm:$0xff] }
 0x314   :  { %1842 = vmatmul.msk.f32.vlgmr.msrb.gmra.mxu3 %vm1087_vm3, %v1173_v5  ;;  %1342 = vmatpush.msrb.mxu2 %v1844_v29  ;;  %1945 = vrcp.f32 %v1984_v34 }
 0x315   :  { %1394 = vmatpush.msrb.mxu3 %v306_v63 }
 0x316   :  { %1343 = vmatpush.msrb.mxu2 %v1843_v7 }
 0x318   :  { %1422 = vmatpush.msra.mxu2 %v1862_v53 }
 0x319   :  { %v1944_v57 = vpop.eup %1943 }
 0x31a   :  { %v1175_v55 = vmul.f32 %v1944_v57, %v2925_v36  ;;  %1423 = vmatpush.msra.mxu2 %v1861_v12  ;;  %v1872_v36 = vld [vmem:[%s3128_s9 + $0xe8] sm:$0xff]  ;;  %v1593_v12 = vld [vmem:[%s3130_s11 + $0x18] sm:$0xff]  ;;  %s1987_s9 = smov 8  }
 0x31c   :  { %1853 = vmatmul.msk.f32.vlgmr.msra.gmra.mxu3 %vm1087_vm3, %v1170_v27  ;;  %1424 = vmatpush.msra.mxu2 %v1860_v46  ;;  %v1592_v46 = vld [vmem:[%s3130_s11 + $0x10] sm:$0xff] }
 0x31d   :  { %1457 = vmatpush.msra.mxu3 %v338_v23  ;;  %v1946_v23 = vpop.eup %1945 }
 0x31e   :  { %1425 = vmatpush.msra.mxu2 %v1859_v60  ;;  %v1536_v44 = vmul.f32 32.0, %v1946_v23  ;;  %vm1540_vm4 = vweird.f32 %v1946_v23  ;;  %v1591_v60 = vld [vmem:[%s3130_s11 + $0x8] sm:$0xff] }
 0x320   :  { %1426 = vmatpush.msra.mxu2 %v1858_v15  ;;  %v1537_v17 = vsub.f32 1.0, %v1536_v44  ;;  %v1590_v15 = vld [vmem:[%s3130_s11] sm:$0xff] }
 0x322   :  { %1427 = vmatpush.msra.mxu2 %v1857_v6 }
 0x324   :  { %1854 = vmatmul.msk.f32.vlgmr.msrb.gmra.mxu3 %vm1087_vm3, %v1174_v45  ;;  %1428 = vmatpush.msra.mxu2 %v1856_v21  ;;  %v1538_v45 = vmul.f32 %v1946_v23, %v1537_v17 }
 0x325   :  { %1480 = vmatpush.msrb.mxu3 %v341_v59 }
 0x326   :  { %1429 = vmatpush.msra.mxu2 %v1855_v33  ;;  %v1539_v40 = vadd.f32 %v1946_v23, %v1538_v45 }
 0x328   :  { %v3069_v59 = vsel %vm1540_vm4, %v1946_v23, %v1539_v40 }
 0x32c   :  { %1865 = vmatmul.msk.f32.vlgmr.msra.gmra.mxu3 %vm1087_vm3, %v1171_v43 }
 0x32d   :  { %1616 = vmatpush.msra.mxu3 %v1593_v12 }
 0x32f   :  { %1617 = vmatpush.msra.mxu3 %v1592_v46 }
 0x331   :  { %1618 = vmatpush.msra.mxu3 %v1591_v60 }
 0x333   :  { %1619 = vmatpush.msra.mxu3 %v1590_v15 }
 0x334   :  { %1866 = vmatmul.msk.f32.vlgmr.msrb.gmra.mxu3 %vm1087_vm3, %v1175_v55 }
 0x387   :  { %v1225_v41 = vpop.f32.mrf.mxu3 }
 0x388   :  { %1840 = vmatmul.msk.f32.gmra.mxu2 %vm902_vm2, %v1225_v41 }
 0x38f   :  { %v1287_v62 = vpop.f32.mrf.mxu3 }
 0x390   :  { %1851 = vmatmul.msk.f32.vlgmr.msrb.gmra.mxu2 %vm902_vm2, %v1287_v62 }
 0x391   :  { %1508 = vmatpush.msrb.mxu2 %v1874_v9 }
 0x393   :  { %1509 = vmatpush.msrb.mxu2 %v1873_v1 }
 0x395   :  { %1510 = vmatpush.msrb.mxu2 %v1872_v36  ;;  %v1259_v58 = vpop.f32.mrf.mxu2 }
 0x396   :  { %v1265_v37 = vadd.f32 %v1259_v58, %v1180_v49  ;;  %v1909_v58 = vld [vmem:[%s3133_s14] ss:$0 sm:$0xff] }
 0x397   :  { %v1310_v38 = vpop.f32.mrf.mxu3  ;;  %1511 = vmatpush.msrb.mxu2 %v1871_v0 }
 0x398   :  { %1852 = vmatmul.msk.f32.gmra.mxu2 %vm902_vm2, %v1310_v38 }
 0x399   :  { %1512 = vmatpush.msrb.mxu2 %v1870_v8 }
 0x39b   :  { %1513 = vmatpush.msrb.mxu2 %v1869_v26 }
 0x39d   :  { %1514 = vmatpush.msrb.mxu2 %v1868_v30 }
 0x39f   :  { %v1373_v31 = vpop.f32.mrf.mxu3  ;;  %1515 = vmatpush.msrb.mxu2 %v1867_v42 }
 0x3a0   :  { %1863 = vmatmul.msk.f32.vlgmr.msra.gmra.mxu2 %vm902_vm2, %v1373_v31  ;;  %v1908_v31 = vld [vmem:[%s3132_s13] ss:$0 sm:$0xff] }
 0x3a7   :  { %v1396_v3 = vpop.f32.mrf.mxu3 }
 0x3a8   :  { %1864 = vmatmul.msk.f32.gmra.mxu2 %vm902_vm2, %v1396_v3 }
 0x3af   :  { %v1459_v51 = vpop.f32.mrf.mxu3 }
 0x3b0   :  { %1875 = vmatmul.msk.f32.vlgmr.msrb.gmra.mxu2 %vm902_vm2, %v1459_v51 }
 0x3b7   :  { %v1482_v24 = vpop.f32.mrf.mxu3 }
 0x3b8   :  { %1876 = vmatmul.msk.f32.gmra.mxu2 %vm902_vm2, %v1482_v24 }
 0x40b   :  { %v1262_v52 = vpop.f32.mrf.mxu2 }
 0x40c   :  { %v1266_v63 = vadd.f32 %v1262_v52, %v1181_v19 }
 0x413   :  { %v1345_v22 = vpop.f32.mrf.mxu2 }
 0x414   :  { %v1351_v47 = vadd.f32 %v1345_v22, %v1265_v37 }
 0x41b   :  { %v1348_v35 = vpop.f32.mrf.mxu2 }
 0x41c   :  { %v1352_v13 = vadd.f32 %v1348_v35, %v1266_v63 }
 0x423   :  { %v1431_v39 = vpop.f32.mrf.mxu2 }
 0x424   :  { %v1437_v18 = vadd.f32 %v1431_v39, %v1351_v47  ;;  %v1910_v47 = vld [vmem:[%s3131_s12] ss:$0 sm:$0xff] }
 0x42b   :  { %v1434_v11 = vpop.f32.mrf.mxu2 }
 0x42c   :  { %v1438_v50 = vadd.f32 %v1434_v11, %v1352_v13 }
 0x433   :  { %v1517_v5 = vpop.f32.mrf.mxu2 }
 0x434   :  { %v1523_v14 = vadd.f32 %v1517_v5, %v1437_v18 }
 0x436   :  { %v1525_v54 = vmax.f32 %v1523_v14, 0.0 }
 0x438   :  { %v1529_v32 = vsel %vm69_vm0, %v1525_v54, 0.0 }
 0x439   :  { %1530 = vadd.xlane.f32.xlu2 %v1529_v32 }
 0x43b   :  { %v1520_v56 = vpop.f32.mrf.mxu2 }
 0x43c   :  { %v1524_v61 = vadd.f32 %v1520_v56, %v1438_v50 }
 0x43e   :  { %v1526_v4 = vmax.f32 %v1524_v61, 0.0 }
 0x440   :  { %v1532_v27 = vsel %vm69_vm0, %v1526_v4, 0.0 }
 0x441   :  { %1533 = vadd.xlane.f32.xlu0 %v1532_v27 }
 0x4ac   :  { %v1531_v10 = vpop.xlane.xlu2 %1530 }
 0x4ad   :  { %v1542_v2 = vmul.f32 %v3069_v59, %v1531_v10 }
 0x4af   :  { %v1544_v43 = vsub.f32 %v1525_v54, %v1542_v2 }
 0x4b1   :  { %v1546_v57 = vmul.f32 %v1544_v43, %v1544_v43 }
 0x4b3   :  { %v1548_v55 = vsel %vm69_vm0, %v1546_v57, 0.0 }
 0x4b4   :  { %1549 = vadd.xlane.f32.xlu1 %v1548_v55  ;;  %v1534_v16 = vpop.xlane.xlu0 %1533 }
 0x4b5   :  { %v1543_v20 = vmul.f32 %v3069_v59, %v1534_v16 }
 0x4b7   :  { %v1545_v29 = vsub.f32 %v1526_v4, %v1543_v20 }
 0x4b9   :  { %v1547_v7 = vmul.f32 %v1545_v29, %v1545_v29 }
 0x4bb   :  { %v1551_v53 = vsel %vm69_vm0, %v1547_v7, 0.0 }
 0x4bc   :  { %1552 = vadd.xlane.f32.xlu2 %v1551_v53 }
 0x527   :  { %v1550_v6 = vpop.xlane.xlu1 %1549 }
 0x528   :  { %v1554_v21 = vmul.f32 %v1550_v6, %v3069_v59  ;;  %v1911_v6 = vld [vmem:[%s3134_s15] ss:$0 sm:$0xff]  ;;  %s1985_s15 = smov [#allocation2]  }
 0x529   :  { %s1693_s7 = sshll.u32 %s1985_s15, 4  ;;  %s1694_s7 = int_to_ptr.vmem [resolvable:$true] %s1693_s7 }
 0x52a   :  { %v1556_v33 = vadd.f32 1e-06, %v1554_v21 }
 0x52c   :  { %1947 = vrsqrt.f32 %v1556_v33  ;;  %vm1564_vm6 = vweird.f32 %v1556_v33 }
 0x52f   :  { %v1553_v41 = vpop.xlane.xlu2 %1552 }
 0x530   :  { %v1555_v9 = vmul.f32 %v1553_v41, %v3069_v59  ;;  %v1912_v41 = vld [vmem:[%s3135_s16] ss:$0 sm:$0xff]  ;;  %s1986_s16 = smov 128  }
 0x532   :  { %v1948_v62 = vpop.eup %1947  ;;  %v1557_v1 = vadd.f32 1e-06, %v1555_v9 }
 0x533   :  { %v1559_v36 = vmul.f32 %v1948_v62, %v1556_v33  ;;  %vm1565_vm5 = vweird.f32 %v1948_v62 }
 0x534   :  { %1949 = vrsqrt.f32 %v1557_v1  ;;  %vm1566_vm7 = vmor %vm1564_vm6, %vm1565_vm5  ;;  %vm1574_vm9 = vweird.f32 %v1557_v1 }
 0x535   :  { %v1560_v0 = vmul.f32 %v1948_v62, %v1559_v36 }
 0x537   :  { %v1561_v8 = vmul.f32 0.5, %v1560_v0 }
 0x539   :  { %v1562_v38 = vsub.f32 1.5, %v1561_v8 }
 0x53a   :  { %v1950_v26 = vpop.eup %1949 }
 0x53b   :  { %v1563_v30 = vmul.f32 %v1948_v62, %v1562_v38  ;;  %v1569_v42 = vmul.f32 %v1950_v26, %v1557_v1  ;;  %vm1575_vm8 = vweird.f32 %v1950_v26 }
 0x53c   :  { %vm1576_vm10 = vmor %vm1574_vm9, %vm1575_vm8 }
 0x53d   :  { %v1567_v3 = vsel %vm1566_vm7, %v1948_v62, %v1563_v30  ;;  %v1570_v51 = vmul.f32 %v1950_v26, %v1569_v42 }
 0x53e   :  { %v1578_v24 = vmul.f32 %v1567_v3, %v1544_v43 }
 0x53f   :  { %v1571_v52 = vmul.f32 0.5, %v1570_v51 }
 0x540   :  { %v1583_v22 = vmul.f32 %v1908_v31, %v1578_v24 }
 0x541   :  { %v1572_v35 = vsub.f32 1.5, %v1571_v52 }
 0x542   :  { %v1588_v39 = vadd.f32 %v1909_v58, %v1583_v22 }
 0x543   :  { %v1573_v48 = vmul.f32 %v1950_v26, %v1572_v35 }
 0x544   :  { %1877 = vmatmul.msk.f32.vlgmr.msra.gmra.mxu3 %vm69_vm0, %v1588_v39 }
 0x545   :  { %v1577_v28 = vsel %vm1576_vm10, %v1950_v26, %v1573_v48 }
 0x546   :  { %v1579_v49 = vmul.f32 %v1577_v28, %v1545_v29 }
 0x548   :  { %v1584_v11 = vmul.f32 %v1908_v31, %v1579_v49 }
 0x54a   :  { %v1589_v37 = vadd.f32 %v1909_v58, %v1584_v11 }
 0x54c   :  { %1878 = vmatmul.msk.f32.gmra.mxu3 %vm69_vm0, %v1589_v37 }
 0x5c7   :  { %v1621_v25 = vpop.f32.mrf.mxu3 }
 0x5c8   :  { %v1622_v19 = vadd.f32 %v1910_v47, %v1621_v25 }
 0x5ca   :  { %v1627_v18 = vadd.f32 %v1622_v19, %v1588_v39 }
 0x5cc   :  { %v1629_v5 = vmax.f32 %v1627_v18, 0.0 }
 0x5ce   :  { %v1633_v14 = vsel %vm69_vm0, %v1629_v5, 0.0 }
 0x5cf   :  { %1634 = vadd.xlane.f32.xlu0 %v1633_v14  ;;  %v1624_v63 = vpop.f32.mrf.mxu3 }
 0x5d0   :  { %v1625_v54 = vadd.f32 %v1910_v47, %v1624_v63 }
 0x5d2   :  { %v1628_v13 = vadd.f32 %v1625_v54, %v1589_v37 }
 0x5d4   :  { %v1630_v32 = vmax.f32 %v1628_v13, 0.0 }
 0x5d6   :  { %v1636_v50 = vsel %vm69_vm0, %v1630_v32, 0.0 }
 0x5d7   :  { %1637 = vadd.xlane.f32.xlu1 %v1636_v50 }
 0x642   :  { %v1635_v56 = vpop.xlane.xlu0 %1634 }
 0x643   :  { %v1639_v61 = vmul.f32 %v1635_v56, %v3069_v59 }
 0x645   :  { %v1641_v4 = vsub.f32 %v1629_v5, %v1639_v61 }
 0x647   :  { %v1643_v27 = vmul.f32 %v1641_v4, %v1641_v4 }
 0x649   :  { %v1645_v34 = vsel %vm69_vm0, %v1643_v27, 0.0 }
 0x64a   :  { %v1638_v23 = vpop.xlane.xlu1 %1637  ;;  %1646 = vadd.xlane.f32.xlu2 %v1645_v34 }
 0x64b   :  { %v1640_v44 = vmul.f32 %v1638_v23, %v3069_v59 }
 0x64d   :  { %v1642_v17 = vsub.f32 %v1630_v32, %v1640_v44 }
 0x64f   :  { %v1644_v45 = vmul.f32 %v1642_v17, %v1642_v17 }
 0x651   :  { %v1648_v40 = vsel %vm69_vm0, %v1644_v45, 0.0 }
 0x652   :  { %1649 = vadd.xlane.f32.xlu0 %v1648_v40 }
 0x6bd   :  { %v1647_v10 = vpop.xlane.xlu2 %1646 }
 0x6be   :  { %v1651_v2 = vmul.f32 %v1647_v10, %v3069_v59 }
 0x6c0   :  { %v1653_v43 = vadd.f32 1e-06, %v1651_v2 }
 0x6c2   :  { %1951 = vrsqrt.f32 %v1653_v43  ;;  %vm1661_vm12 = vweird.f32 %v1653_v43 }
 0x6c5   :  { %v1650_v57 = vpop.xlane.xlu0 %1649 }
 0x6c6   :  { %v1652_v55 = vmul.f32 %v1650_v57, %v3069_v59 }
 0x6c8   :  { %v1952_v16 = vpop.eup %1951  ;;  %v1654_v20 = vadd.f32 1e-06, %v1652_v55 }
 0x6c9   :  { %v1656_v29 = vmul.f32 %v1952_v16, %v1653_v43  ;;  %vm1662_vm11 = vweird.f32 %v1952_v16 }
 0x6ca   :  { %1953 = vrsqrt.f32 %v1654_v20  ;;  %vm1663_vm13 = vmor %vm1661_vm12, %vm1662_vm11  ;;  %vm1671_vm15 = vweird.f32 %v1654_v20 }
 0x6cb   :  { %v1657_v7 = vmul.f32 %v1952_v16, %v1656_v29 }
 0x6cd   :  { %v1658_v53 = vmul.f32 0.5, %v1657_v7 }
 0x6cf   :  { %v1659_v12 = vsub.f32 1.5, %v1658_v53 }
 0x6d0   :  { %v1954_v46 = vpop.eup %1953 }
 0x6d1   :  { %v1660_v60 = vmul.f32 %v1952_v16, %v1659_v12  ;;  %v1666_v15 = vmul.f32 %v1954_v46, %v1654_v20  ;;  %vm1672_vm14 = vweird.f32 %v1954_v46 }
 0x6d2   :  { %vm1673_vm1 = vmor %vm1671_vm15, %vm1672_vm14 }
 0x6d3   :  { %v1664_v21 = vsel %vm1663_vm13, %v1952_v16, %v1660_v60  ;;  %v1667_v33 = vmul.f32 %v1954_v46, %v1666_v15 }
 0x6d4   :  { %v1675_v59 = vmul.f32 %v1664_v21, %v1641_v4 }
 0x6d5   :  { %v1668_v9 = vmul.f32 0.5, %v1667_v33 }
 0x6d6   :  { %v1680_v62 = vmul.f32 %v1911_v6, %v1675_v59 }
 0x6d7   :  { %v1669_v1 = vsub.f32 1.5, %v1668_v9 }
 0x6d8   :  { %v1685_v36 = vadd.f32 %v1912_v41, %v1680_v62 }
 0x6d9   :  { %v1670_v0 = vmul.f32 %v1954_v46, %v1669_v1 }
 0x6da   :  { %1687 = vst.msk [vmem:[#allocation2] sm:$0xff] %vm69_vm0, %v1685_v36 }
 0x6db   :  { %v1674_v8 = vsel %vm1673_vm1, %v1954_v46, %v1670_v0 }
 0x6dc   :  { %v1676_v38 = vmul.f32 %v1674_v8, %v1642_v17 }
 0x6de   :  { %v1681_v26 = vmul.f32 %v1911_v6, %v1676_v38 }
 0x6e0   :  { %v1686_v30 = vadd.f32 %v1912_v41, %v1681_v26 }
 0x6e2   :  { %1688 = vst.msk [vmem:[#allocation2 + $0x8] sm:$0xff] %vm69_vm0, %v1686_v30 }
 0x6e3   :  { %1701 = dma.vmem_to_hbm [thread:$0]  %s1694_s7, 256, %s1696_s28, [#allocation3], %s1986_s16, %s1986_s16, %s1987_s9  }
 0x6e4   :  { %1981 = dma.done.wait [#allocation3], 256  }
 0x6e5   :  { %1982 = vsyncadd [#allocation3], 4294967040 }
 0x6e6   :  { %1706 = vsyncpa [#allocation3], 1 }

</bundles_post_ra>
